<compile_context>
chip_gen: v5e
topology: v5e:2x2
jax: 0.10.0
libtpu: 0.0.40
codegen_flags: <defaults>
</compile_context>

<pallas_src>
import jax
import jax.numpy as jnp
from jax import lax
from jax.experimental import pallas as pl
from jax.experimental.pallas import tpu as pltpu


# ----------------------------- Pallas kernel --------------------------------


def _sentiment_lstm_kernel(
    ids_ref,    # (B, T)       i32  token ids (SMEM)
    emb_ref,    # (V, 1, E)    f32  embedding table (VMEM; leading-dim row gather)
    wih_ref,    # (L, E, 4H)   f32  pre-transposed, i/f/o columns pre-scaled by 0.5
    whh_ref,    # (L, H, 4H)   f32  pre-transposed, i/f/o columns pre-scaled by 0.5
    b_ref,      # (L, 1, 4H)   f32  fused bias (b_ih + b_hh), i/f/o pre-scaled by 0.5
    h0_ref,     # (L, B, H)    f32
    c0_ref,     # (L, B, H)    f32
    fcw_ref,    # (O, H)       f32  FC weight (PyTorch layout)
    fcb_ref,    # (1, O)       f32
    sig_ref,    # (B, O)       f32  out: sigmoid(fc(last hidden))
    hn_ref,     # (L, B, H)    f32  out: final hidden per layer
    cn_ref,     # (L, B, H)    f32  out: final cell per layer
    xemb_scr,   # (T*B, E)     f32  scratch: gathered embeddings, time-major flat
    gx_scr,     # (2, T*B, 4H) f32  scratch: ping-pong gate pre-activations per layer
):
    B, T = ids_ref.shape
    L = h0_ref.shape[0]
    H = h0_ref.shape[-1]
    G = 4 * H
    O = fcw_ref.shape[0]

    # ---- fused embedding gather: ids from SMEM, rows from the VMEM table ----------
    for t in range(T):                           # static, tiny
        for b in range(B):
            row = t * B + b
            xemb_scr[row:row + 1, :] = emb_ref[ids_ref[b, t]]     # (1, E)

    # ---- layer-0 hoisted x-matmul: ONE batched MXU push + single bias add ---------
    gx_scr[0, :, :] = (
        jnp.dot(xemb_scr[...], wih_ref[0], preferred_element_type=jnp.float32)
        + b_ref[0]
    )

    last_h = None
    for layer in range(L):                       # static, small
        p = layer % 2                            # gx buffer this layer reads
        q = (layer + 1) % 2                      # gx buffer the next layer will read
        whh_l = whh_ref[layer]                   # (H, 4H)
        interleave_next = layer < (L - 1)
        if interleave_next:
            wih_next = wih_ref[layer + 1]        # (H, 4H)
            # hoisted broadcast (JAX does not CSE broadcast_in_dim inside the unroll)
            bias_next = jnp.broadcast_to(b_ref[layer + 1], (B, G))

        h = h0_ref[layer]                        # (B, H)
        c = c0_ref[layer]                        # (B, H)

        # fully static unrolled recurrence: whole serial chain visible to the scheduler
        for t in range(T):
            gates = gx_scr[p, t * B:(t + 1) * B, :] + jnp.dot(
                h, whh_l, preferred_element_type=jnp.float32
            )                                    # (B, 4H)
            # single full-vreg EUP pass: i/f/o pre-activations were pre-scaled by 0.5,
            # so sigmoid(x) = 0.5*tanh(x/2) + 0.5 (VPU); g column keeps plain tanh.
            th = jnp.tanh(gates)
            i_g = 0.5 * th[:, 0:H] + 0.5
            f_g = 0.5 * th[:, H:2 * H] + 0.5
            g_g = th[:, 2 * H:3 * H]
            o_g = 0.5 * th[:, 3 * H:4 * H] + 0.5
            c = f_g * c + i_g * g_g
            h = o_g * jnp.tanh(c)
            if interleave_next:
                # next layer's x-matmul issued under this layer's serial h@w_hh chain
                gx_scr[q, t * B:(t + 1) * B, :] = (
                    jnp.dot(h, wih_next, preferred_element_type=jnp.float32)
                    + bias_next
                )

        hn_ref[layer] = h
        cn_ref[layer] = c
        last_h = h                               # lstm_out[:, -1] of this layer

    # Dropout is a no-op in the PyTorch forward (output overwritten by fc1(lstm_out)).
    if O == 1:
        # VPU multiply + lane reduce; avoids a 1-column MXU matmul on the epilogue.
        logits = jnp.sum(last_h * fcw_ref[...], axis=-1, keepdims=True) + fcb_ref[...]
    else:
        logits = lax.dot_general(
            last_h, fcw_ref[...], (((1,), (1,)), ((), ())),
            preferred_element_type=jnp.float32,
        ) + fcb_ref[...]
    sig_ref[...] = jax.nn.sigmoid(logits)


# ------------------------------ JAX wrapper ---------------------------------


def prepare_kernel_params(params):
    """One-time conversion of PyTorch-layout params to kernel-ready layouts.

    - w_ih -> (L, E, 4H), w_hh -> (L, H, 4H): kernel never transposes.
    - i/f/o gate columns of w_ih, w_hh and the fused bias scaled by 0.5 so the kernel
      recovers sigmoid(x) = 0.5*tanh(x/2) + 0.5 from a single tanh pass per step.
    - embedding table reshaped to (V, 1, E) for robust leading-dim row gather in VMEM.
    """
    H = params["w_hh"].shape[-1]
    gate_scale = jnp.concatenate([
        jnp.full((2 * H,), 0.5, jnp.float32),    # i, f
        jnp.ones((H,), jnp.float32),             # g (plain tanh)
        jnp.full((H,), 0.5, jnp.float32),        # o
    ])
    return {
        "emb": params["embedding"].astype(jnp.float32)[:, None, :],            # (V,1,E)
        "wih": jnp.swapaxes(params["w_ih"], 1, 2).astype(jnp.float32) * gate_scale,
        "whh": jnp.swapaxes(params["w_hh"], 1, 2).astype(jnp.float32) * gate_scale,
        "bias": params["bias"].astype(jnp.float32) * gate_scale,               # (L,1,4H)
        "fc_w": params["fc_w"].astype(jnp.float32),                            # (O,H)
        "fc_b": params["fc_b"].astype(jnp.float32),                            # (1,O)
    }


@jax.jit
def sentiment_rnn_forward(x_ids, hidden, kparams):
    """Forward pass matching SentimentRNN.forward.

    x_ids : (B, T) int32 token ids
    hidden: (h0, c0) each (L, B, H) float32
    kparams: output of prepare_kernel_params (kernel-ready layouts)
    returns (sig_out (B, O), (h_n, c_n))
    """
    emb = kparams["emb"]        # (V, 1, E)
    wih = kparams["wih"]        # (L, E, 4H)
    whh = kparams["whh"]        # (L, H, 4H)
    bias = kparams["bias"]      # (L, 1, 4H)
    fc_w = kparams["fc_w"]      # (O, H)
    fc_b = kparams["fc_b"]      # (1, O)
    h0, c0 = hidden

    B, T = x_ids.shape
    L, _, H = h0.shape
    E = emb.shape[-1]
    O = fc_w.shape[0]
    assert E == H, "kernel stacks per-layer w_ih; requires embedding_dim == hidden_dim"
    assert L >= 1, "n_layers must be >= 1"

    vmem = pl.BlockSpec(memory_space=pltpu.MemorySpace.VMEM)
    smem = pl.BlockSpec(memory_space=pltpu.MemorySpace.SMEM)

    sig_out, h_n, c_n = pl.pallas_call(
        _sentiment_lstm_kernel,
        out_shape=(
            jax.ShapeDtypeStruct((B, O), jnp.float32),
            jax.ShapeDtypeStruct((L, B, H), jnp.float32),
            jax.ShapeDtypeStruct((L, B, H), jnp.float32),
        ),
        in_specs=[smem] + [vmem] * 8,
        out_specs=(vmem, vmem, vmem),
        scratch_shapes=[
            pltpu.VMEM((T * B, E), jnp.float32),          # gathered embeddings
            pltpu.VMEM((2, T * B, 4 * H), jnp.float32),   # ping-pong gate pre-acts
        ],
    )(x_ids.astype(jnp.int32), emb, wih, whh, bias, h0, c0, fc_w, fc_b)

    return sig_out, (h_n, c_n)


# --------------------------- pure-JAX reference ------------------------------


def reference_forward(x_ids, hidden, params):
    emb = params["embedding"][x_ids].astype(jnp.float32)   # (B, T, E)
    h0, c0 = hidden
    L = h0.shape[0]
    H = h0.shape[-1]
    seq = emb
    h_n, c_n = [], []
    for layer in range(L):
        wih_t = params["w_ih"][layer].T
        whh_t = params["w_hh"][layer].T
        b = params["bias"][layer]

        def step(carry, x_t):
            h, c = carry
            g = x_t @ wih_t + h @ whh_t + b
            i = jax.nn.sigmoid(g[:, 0:H])
            f = jax.nn.sigmoid(g[:, H:2 * H])
            gg = jnp.tanh(g[:, 2 * H:3 * H])
            o = jax.nn.sigmoid(g[:, 3 * H:4 * H])
            c = f * c + i * gg
            h = o * jnp.tanh(c)
            return (h, c), h

        (h_f, c_f), outs = lax.scan(step, (h0[layer], c0[layer]),
                                    jnp.transpose(seq, (1, 0, 2)))
        seq = jnp.transpose(outs, (1, 0, 2))
        h_n.append(h_f)
        c_n.append(c_f)
    last = seq[:, -1]
    sig = jax.nn.sigmoid(last @ params["fc_w"].T + params["fc_b"])
    return sig, (jnp.stack(h_n), jnp.stack(c_n))


# --------------------------------- main --------------------------------------


def init_params(key, vocab_size, embedding_dim, hidden_dim, n_layers, output_size):
    assert embedding_dim == hidden_dim, "kernel assumes E == H for stacked weights"
    ks = jax.random.split(key, 8)
    scale = 1.0 / jnp.sqrt(hidden_dim)
    params = {
        "embedding": jax.random.normal(ks[0], (vocab_size, embedding_dim), jnp.float32),
        "w_ih": jax.random.uniform(ks[1], (n_layers, 4 * hidden_dim, embedding_dim),
                                   jnp.float32, -scale, scale),
        "w_hh": jax.random.uniform(ks[2], (n_layers, 4 * hidden_dim, hidden_dim),
                                   jnp.float32, -scale, scale),
        # bias = b_ih + b_hh, folded into one (L, 1, 4H) tensor
        "bias": (jax.random.uniform(ks[3], (n_layers, 1, 4 * hidden_dim),
                                    jnp.float32, -scale, scale)
                 + jax.random.uniform(ks[4], (n_layers, 1, 4 * hidden_dim),
                                      jnp.float32, -scale, scale)),
        "fc_w": jax.random.uniform(ks[5], (output_size, hidden_dim),
                                   jnp.float32, -scale, scale),
        "fc_b": jax.random.uniform(ks[6], (1, output_size),
                                   jnp.float32, -scale, scale),
    }
    return params


if __name__ == "__main__":
    # small config consistent with the module
    vocab_size = 50
    output_size = 1
    embedding_dim = 32
    hidden_dim = 32
    n_layers = 2
    batch = 2
    seq_len = 8

    key = jax.random.PRNGKey(0)
    k_param, k_x = jax.random.split(key)
    params = init_params(k_param, vocab_size, embedding_dim, hidden_dim,
                         n_layers, output_size)
    kparams = prepare_kernel_params(params)           # one-time layout/pre-scale prep

    x_ids = jax.random.randint(k_x, (batch, seq_len), 0, vocab_size, jnp.int32)
    # init_hidden(batch): zeros of shape (n_layers, batch, hidden_dim)
    h0 = jnp.zeros((n_layers, batch, hidden_dim), jnp.float32)
    c0 = jnp.zeros((n_layers, batch, hidden_dim), jnp.float32)

    sig_out, (h_n, c_n) = sentiment_rnn_forward(x_ids, (h0, c0), kparams)
    jax.block_until_ready((sig_out, h_n, c_n))

    # correctness check against a pure-JAX reference (original PyTorch-layout params)
    ref_sig, (ref_h, ref_c) = reference_forward(x_ids, (h0, c0), params)
    assert jnp.allclose(sig_out, ref_sig, atol=1e-4), "sig_out mismatch"
    assert jnp.allclose(h_n, ref_h, atol=1e-4), "h_n mismatch"
    assert jnp.allclose(c_n, ref_c, atol=1e-4), "c_n mismatch"

    print("KERNEL_OK")
</pallas_src>

<mosaic_0001>
module attributes {stable_mosaic.version = 11 : i64} {
  func.func @_sentiment_lstm_kernel(%arg0: memref<2x8xi32, #tpu.memory_space<smem>>, %arg1: memref<50x1x32xf32, #tpu.memory_space<vmem>>, %arg2: memref<2x32x128xf32, #tpu.memory_space<vmem>>, %arg3: memref<2x32x128xf32, #tpu.memory_space<vmem>>, %arg4: memref<2x1x128xf32, #tpu.memory_space<vmem>>, %arg5: memref<2x2x32xf32, #tpu.memory_space<vmem>>, %arg6: memref<2x2x32xf32, #tpu.memory_space<vmem>>, %arg7: memref<1x32xf32, #tpu.memory_space<vmem>>, %arg8: memref<1x1xf32, #tpu.memory_space<vmem>>, %arg9: memref<2x1xf32, #tpu.memory_space<vmem>>, %arg10: memref<2x2x32xf32, #tpu.memory_space<vmem>>, %arg11: memref<2x2x32xf32, #tpu.memory_space<vmem>>, %arg12: memref<16x32xf32, #tpu.memory_space<vmem>>, %arg13: memref<2x16x128xf32, #tpu.memory_space<vmem>>) attributes {dimension_semantics = [], scalar_prefetch = 0 : i64, scratch_operands = 2 : i64, tpu.core_type = #tpu.core_type<tc>} {
    %c0 = arith.constant 0 : index
    %c0_0 = arith.constant 0 : index
    %0 = memref.load %arg0[%c0, %c0_0] : memref<2x8xi32, #tpu.memory_space<smem>>
    %1 = arith.index_cast %0 : i32 to index
    %c0_1 = arith.constant 0 : index
    %c0_2 = arith.constant 0 : index
    %2 = vector.load %arg1[%1, %c0_1, %c0_2] : memref<50x1x32xf32, #tpu.memory_space<vmem>>, vector<1x1x32xf32>
    %3 = vector.shape_cast %2 : vector<1x1x32xf32> to vector<1x32xf32>
    %c0_3 = arith.constant 0 : index
    %c0_4 = arith.constant 0 : index
    %4 = vector.load %arg12[%c0_3, %c0_4] : memref<16x32xf32, #tpu.memory_space<vmem>>, vector<1x32xf32>
    tpu.vector_store %arg12[%c0_3, %c0_4], %3 {strides = array<i32>} : memref<16x32xf32, #tpu.memory_space<vmem>>, vector<1x32xf32>,
    %c1 = arith.constant 1 : index
    %c0_5 = arith.constant 0 : index
    %5 = memref.load %arg0[%c1, %c0_5] : memref<2x8xi32, #tpu.memory_space<smem>>
    %6 = arith.index_cast %5 : i32 to index
    %c0_6 = arith.constant 0 : index
    %c0_7 = arith.constant 0 : index
    %7 = vector.load %arg1[%6, %c0_6, %c0_7] : memref<50x1x32xf32, #tpu.memory_space<vmem>>, vector<1x1x32xf32>
    %8 = vector.shape_cast %7 : vector<1x1x32xf32> to vector<1x32xf32>
    %c1_8 = arith.constant 1 : index
    %c0_9 = arith.constant 0 : index
    %9 = vector.load %arg12[%c1_8, %c0_9] : memref<16x32xf32, #tpu.memory_space<vmem>>, vector<1x32xf32>
    tpu.vector_store %arg12[%c1_8, %c0_9], %8 {strides = array<i32>} : memref<16x32xf32, #tpu.memory_space<vmem>>, vector<1x32xf32>,
    %c0_10 = arith.constant 0 : index
    %c1_11 = arith.constant 1 : index
    %10 = memref.load %arg0[%c0_10, %c1_11] : memref<2x8xi32, #tpu.memory_space<smem>>
    %11 = arith.index_cast %10 : i32 to index
    %c0_12 = arith.constant 0 : index
    %c0_13 = arith.constant 0 : index
    %12 = vector.load %arg1[%11, %c0_12, %c0_13] : memref<50x1x32xf32, #tpu.memory_space<vmem>>, vector<1x1x32xf32>
    %13 = vector.shape_cast %12 : vector<1x1x32xf32> to vector<1x32xf32>
    %c2 = arith.constant 2 : index
    %c0_14 = arith.constant 0 : index
    %14 = vector.load %arg12[%c2, %c0_14] : memref<16x32xf32, #tpu.memory_space<vmem>>, vector<1x32xf32>
    tpu.vector_store %arg12[%c2, %c0_14], %13 {strides = array<i32>} : memref<16x32xf32, #tpu.memory_space<vmem>>, vector<1x32xf32>,
    %c1_15 = arith.constant 1 : index
    %c1_16 = arith.constant 1 : index
    %15 = memref.load %arg0[%c1_15, %c1_16] : memref<2x8xi32, #tpu.memory_space<smem>>
    %16 = arith.index_cast %15 : i32 to index
    %c0_17 = arith.constant 0 : index
    %c0_18 = arith.constant 0 : index
    %17 = vector.load %arg1[%16, %c0_17, %c0_18] : memref<50x1x32xf32, #tpu.memory_space<vmem>>, vector<1x1x32xf32>
    %18 = vector.shape_cast %17 : vector<1x1x32xf32> to vector<1x32xf32>
    %c3 = arith.constant 3 : index
    %c0_19 = arith.constant 0 : index
    %19 = vector.load %arg12[%c3, %c0_19] : memref<16x32xf32, #tpu.memory_space<vmem>>, vector<1x32xf32>
    tpu.vector_store %arg12[%c3, %c0_19], %18 {strides = array<i32>} : memref<16x32xf32, #tpu.memory_space<vmem>>, vector<1x32xf32>,
    %c0_20 = arith.constant 0 : index
    %c2_21 = arith.constant 2 : index
    %20 = memref.load %arg0[%c0_20, %c2_21] : memref<2x8xi32, #tpu.memory_space<smem>>
    %21 = arith.index_cast %20 : i32 to index
    %c0_22 = arith.constant 0 : index
    %c0_23 = arith.constant 0 : index
    %22 = vector.load %arg1[%21, %c0_22, %c0_23] : memref<50x1x32xf32, #tpu.memory_space<vmem>>, vector<1x1x32xf32>
    %23 = vector.shape_cast %22 : vector<1x1x32xf32> to vector<1x32xf32>
    %c4 = arith.constant 4 : index
    %c0_24 = arith.constant 0 : index
    %24 = vector.load %arg12[%c4, %c0_24] : memref<16x32xf32, #tpu.memory_space<vmem>>, vector<1x32xf32>
    tpu.vector_store %arg12[%c4, %c0_24], %23 {strides = array<i32>} : memref<16x32xf32, #tpu.memory_space<vmem>>, vector<1x32xf32>,
    %c1_25 = arith.constant 1 : index
    %c2_26 = arith.constant 2 : index
    %25 = memref.load %arg0[%c1_25, %c2_26] : memref<2x8xi32, #tpu.memory_space<smem>>
    %26 = arith.index_cast %25 : i32 to index
    %c0_27 = arith.constant 0 : index
    %c0_28 = arith.constant 0 : index
    %27 = vector.load %arg1[%26, %c0_27, %c0_28] : memref<50x1x32xf32, #tpu.memory_space<vmem>>, vector<1x1x32xf32>
    %28 = vector.shape_cast %27 : vector<1x1x32xf32> to vector<1x32xf32>
    %c5 = arith.constant 5 : index
    %c0_29 = arith.constant 0 : index
    %29 = vector.load %arg12[%c5, %c0_29] : memref<16x32xf32, #tpu.memory_space<vmem>>, vector<1x32xf32>
    tpu.vector_store %arg12[%c5, %c0_29], %28 {strides = array<i32>} : memref<16x32xf32, #tpu.memory_space<vmem>>, vector<1x32xf32>,
    %c0_30 = arith.constant 0 : index
    %c3_31 = arith.constant 3 : index
    %30 = memref.load %arg0[%c0_30, %c3_31] : memref<2x8xi32, #tpu.memory_space<smem>>
    %31 = arith.index_cast %30 : i32 to index
    %c0_32 = arith.constant 0 : index
    %c0_33 = arith.constant 0 : index
    %32 = vector.load %arg1[%31, %c0_32, %c0_33] : memref<50x1x32xf32, #tpu.memory_space<vmem>>, vector<1x1x32xf32>
    %33 = vector.shape_cast %32 : vector<1x1x32xf32> to vector<1x32xf32>
    %c6 = arith.constant 6 : index
    %c0_34 = arith.constant 0 : index
    %34 = vector.load %arg12[%c6, %c0_34] : memref<16x32xf32, #tpu.memory_space<vmem>>, vector<1x32xf32>
    tpu.vector_store %arg12[%c6, %c0_34], %33 {strides = array<i32>} : memref<16x32xf32, #tpu.memory_space<vmem>>, vector<1x32xf32>,
    %c1_35 = arith.constant 1 : index
    %c3_36 = arith.constant 3 : index
    %35 = memref.load %arg0[%c1_35, %c3_36] : memref<2x8xi32, #tpu.memory_space<smem>>
    %36 = arith.index_cast %35 : i32 to index
    %c0_37 = arith.constant 0 : index
    %c0_38 = arith.constant 0 : index
    %37 = vector.load %arg1[%36, %c0_37, %c0_38] : memref<50x1x32xf32, #tpu.memory_space<vmem>>, vector<1x1x32xf32>
    %38 = vector.shape_cast %37 : vector<1x1x32xf32> to vector<1x32xf32>
    %c7 = arith.constant 7 : index
    %c0_39 = arith.constant 0 : index
    %39 = vector.load %arg12[%c7, %c0_39] : memref<16x32xf32, #tpu.memory_space<vmem>>, vector<1x32xf32>
    tpu.vector_store %arg12[%c7, %c0_39], %38 {strides = array<i32>} : memref<16x32xf32, #tpu.memory_space<vmem>>, vector<1x32xf32>,
    %c0_40 = arith.constant 0 : index
    %c4_41 = arith.constant 4 : index
    %40 = memref.load %arg0[%c0_40, %c4_41] : memref<2x8xi32, #tpu.memory_space<smem>>
    %41 = arith.index_cast %40 : i32 to index
    %c0_42 = arith.constant 0 : index
    %c0_43 = arith.constant 0 : index
    %42 = vector.load %arg1[%41, %c0_42, %c0_43] : memref<50x1x32xf32, #tpu.memory_space<vmem>>, vector<1x1x32xf32>
    %43 = vector.shape_cast %42 : vector<1x1x32xf32> to vector<1x32xf32>
    %c8 = arith.constant 8 : index
    %c0_44 = arith.constant 0 : index
    %44 = vector.load %arg12[%c8, %c0_44] : memref<16x32xf32, #tpu.memory_space<vmem>>, vector<1x32xf32>
    tpu.vector_store %arg12[%c8, %c0_44], %43 {strides = array<i32>} : memref<16x32xf32, #tpu.memory_space<vmem>>, vector<1x32xf32>,
    %c1_45 = arith.constant 1 : index
    %c4_46 = arith.constant 4 : index
    %45 = memref.load %arg0[%c1_45, %c4_46] : memref<2x8xi32, #tpu.memory_space<smem>>
    %46 = arith.index_cast %45 : i32 to index
    %c0_47 = arith.constant 0 : index
    %c0_48 = arith.constant 0 : index
    %47 = vector.load %arg1[%46, %c0_47, %c0_48] : memref<50x1x32xf32, #tpu.memory_space<vmem>>, vector<1x1x32xf32>
    %48 = vector.shape_cast %47 : vector<1x1x32xf32> to vector<1x32xf32>
    %c9 = arith.constant 9 : index
    %c0_49 = arith.constant 0 : index
    %49 = vector.load %arg12[%c9, %c0_49] : memref<16x32xf32, #tpu.memory_space<vmem>>, vector<1x32xf32>
    tpu.vector_store %arg12[%c9, %c0_49], %48 {strides = array<i32>} : memref<16x32xf32, #tpu.memory_space<vmem>>, vector<1x32xf32>,
    %c0_50 = arith.constant 0 : index
    %c5_51 = arith.constant 5 : index
    %50 = memref.load %arg0[%c0_50, %c5_51] : memref<2x8xi32, #tpu.memory_space<smem>>
    %51 = arith.index_cast %50 : i32 to index
    %c0_52 = arith.constant 0 : index
    %c0_53 = arith.constant 0 : index
    %52 = vector.load %arg1[%51, %c0_52, %c0_53] : memref<50x1x32xf32, #tpu.memory_space<vmem>>, vector<1x1x32xf32>
    %53 = vector.shape_cast %52 : vector<1x1x32xf32> to vector<1x32xf32>
    %c10 = arith.constant 10 : index
    %c0_54 = arith.constant 0 : index
    %54 = vector.load %arg12[%c10, %c0_54] : memref<16x32xf32, #tpu.memory_space<vmem>>, vector<1x32xf32>
    tpu.vector_store %arg12[%c10, %c0_54], %53 {strides = array<i32>} : memref<16x32xf32, #tpu.memory_space<vmem>>, vector<1x32xf32>,
    %c1_55 = arith.constant 1 : index
    %c5_56 = arith.constant 5 : index
    %55 = memref.load %arg0[%c1_55, %c5_56] : memref<2x8xi32, #tpu.memory_space<smem>>
    %56 = arith.index_cast %55 : i32 to index
    %c0_57 = arith.constant 0 : index
    %c0_58 = arith.constant 0 : index
    %57 = vector.load %arg1[%56, %c0_57, %c0_58] : memref<50x1x32xf32, #tpu.memory_space<vmem>>, vector<1x1x32xf32>
    %58 = vector.shape_cast %57 : vector<1x1x32xf32> to vector<1x32xf32>
    %c11 = arith.constant 11 : index
    %c0_59 = arith.constant 0 : index
    %59 = vector.load %arg12[%c11, %c0_59] : memref<16x32xf32, #tpu.memory_space<vmem>>, vector<1x32xf32>
    tpu.vector_store %arg12[%c11, %c0_59], %58 {strides = array<i32>} : memref<16x32xf32, #tpu.memory_space<vmem>>, vector<1x32xf32>,
    %c0_60 = arith.constant 0 : index
    %c6_61 = arith.constant 6 : index
    %60 = memref.load %arg0[%c0_60, %c6_61] : memref<2x8xi32, #tpu.memory_space<smem>>
    %61 = arith.index_cast %60 : i32 to index
    %c0_62 = arith.constant 0 : index
    %c0_63 = arith.constant 0 : index
    %62 = vector.load %arg1[%61, %c0_62, %c0_63] : memref<50x1x32xf32, #tpu.memory_space<vmem>>, vector<1x1x32xf32>
    %63 = vector.shape_cast %62 : vector<1x1x32xf32> to vector<1x32xf32>
    %c12 = arith.constant 12 : index
    %c0_64 = arith.constant 0 : index
    %64 = vector.load %arg12[%c12, %c0_64] : memref<16x32xf32, #tpu.memory_space<vmem>>, vector<1x32xf32>
    tpu.vector_store %arg12[%c12, %c0_64], %63 {strides = array<i32>} : memref<16x32xf32, #tpu.memory_space<vmem>>, vector<1x32xf32>,
    %c1_65 = arith.constant 1 : index
    %c6_66 = arith.constant 6 : index
    %65 = memref.load %arg0[%c1_65, %c6_66] : memref<2x8xi32, #tpu.memory_space<smem>>
    %66 = arith.index_cast %65 : i32 to index
    %c0_67 = arith.constant 0 : index
    %c0_68 = arith.constant 0 : index
    %67 = vector.load %arg1[%66, %c0_67, %c0_68] : memref<50x1x32xf32, #tpu.memory_space<vmem>>, vector<1x1x32xf32>
    %68 = vector.shape_cast %67 : vector<1x1x32xf32> to vector<1x32xf32>
    %c13 = arith.constant 13 : index
    %c0_69 = arith.constant 0 : index
    %69 = vector.load %arg12[%c13, %c0_69] : memref<16x32xf32, #tpu.memory_space<vmem>>, vector<1x32xf32>
    tpu.vector_store %arg12[%c13, %c0_69], %68 {strides = array<i32>} : memref<16x32xf32, #tpu.memory_space<vmem>>, vector<1x32xf32>,
    %c0_70 = arith.constant 0 : index
    %c7_71 = arith.constant 7 : index
    %70 = memref.load %arg0[%c0_70, %c7_71] : memref<2x8xi32, #tpu.memory_space<smem>>
    %71 = arith.index_cast %70 : i32 to index
    %c0_72 = arith.constant 0 : index
    %c0_73 = arith.constant 0 : index
    %72 = vector.load %arg1[%71, %c0_72, %c0_73] : memref<50x1x32xf32, #tpu.memory_space<vmem>>, vector<1x1x32xf32>
    %73 = vector.shape_cast %72 : vector<1x1x32xf32> to vector<1x32xf32>
    %c14 = arith.constant 14 : index
    %c0_74 = arith.constant 0 : index
    %74 = vector.load %arg12[%c14, %c0_74] : memref<16x32xf32, #tpu.memory_space<vmem>>, vector<1x32xf32>
    tpu.vector_store %arg12[%c14, %c0_74], %73 {strides = array<i32>} : memref<16x32xf32, #tpu.memory_space<vmem>>, vector<1x32xf32>,
    %c1_75 = arith.constant 1 : index
    %c7_76 = arith.constant 7 : index
    %75 = memref.load %arg0[%c1_75, %c7_76] : memref<2x8xi32, #tpu.memory_space<smem>>
    %76 = arith.index_cast %75 : i32 to index
    %c0_77 = arith.constant 0 : index
    %c0_78 = arith.constant 0 : index
    %77 = vector.load %arg1[%76, %c0_77, %c0_78] : memref<50x1x32xf32, #tpu.memory_space<vmem>>, vector<1x1x32xf32>
    %78 = vector.shape_cast %77 : vector<1x1x32xf32> to vector<1x32xf32>
    %c15 = arith.constant 15 : index
    %c0_79 = arith.constant 0 : index
    %79 = vector.load %arg12[%c15, %c0_79] : memref<16x32xf32, #tpu.memory_space<vmem>>, vector<1x32xf32>
    tpu.vector_store %arg12[%c15, %c0_79], %78 {strides = array<i32>} : memref<16x32xf32, #tpu.memory_space<vmem>>, vector<1x32xf32>,
    %c0_80 = arith.constant 0 : index
    %c0_81 = arith.constant 0 : index
    %80 = vector.load %arg12[%c0_80, %c0_81] : memref<16x32xf32, #tpu.memory_space<vmem>>, vector<16x32xf32>
    %c0_82 = arith.constant 0 : index
    %c0_83 = arith.constant 0 : index
    %c0_84 = arith.constant 0 : index
    %81 = vector.load %arg2[%c0_82, %c0_83, %c0_84] : memref<2x32x128xf32, #tpu.memory_space<vmem>>, vector<1x32x128xf32>
    %82 = vector.shape_cast %81 : vector<1x32x128xf32> to vector<32x128xf32>
    %cst = arith.constant dense<0.000000e+00> : vector<16x128xf32>
    %83 = tpu.matmul %80, %82, %cst {dimension_numbers = #tpu.dot_dimension_numbers<[1], [0], [0], [1], [0, 0, 1, 1], [], []>} : vector<16x32xf32>, vector<32x128xf32>, vector<16x128xf32> -> vector<16x128xf32>
    %c0_85 = arith.constant 0 : index
    %c0_86 = arith.constant 0 : index
    %c0_87 = arith.constant 0 : index
    %84 = vector.load %arg4[%c0_85, %c0_86, %c0_87] : memref<2x1x128xf32, #tpu.memory_space<vmem>>, vector<1x1x128xf32>
    %85 = vector.shape_cast %84 : vector<1x1x128xf32> to vector<1x128xf32>
    %86 = vector.broadcast %85 : vector<1x128xf32> to vector<16x128xf32>
    %87 = arith.addf %83, %86 : vector<16x128xf32>
    %c0_88 = arith.constant 0 : index
    %c0_89 = arith.constant 0 : index
    %c0_90 = arith.constant 0 : index
    %88 = vector.load %arg13[%c0_88, %c0_89, %c0_90] : memref<2x16x128xf32, #tpu.memory_space<vmem>>, vector<1x16x128xf32>
    %89 = vector.shape_cast %88 : vector<1x16x128xf32> to vector<16x128xf32>
    %90 = vector.shape_cast %87 : vector<16x128xf32> to vector<1x16x128xf32>
    tpu.vector_store %arg13[%c0_88, %c0_89, %c0_90], %90 {strides = array<i32>} : memref<2x16x128xf32, #tpu.memory_space<vmem>>, vector<1x16x128xf32>,
    %c0_91 = arith.constant 0 : index
    %c0_92 = arith.constant 0 : index
    %c0_93 = arith.constant 0 : index
    %91 = vector.load %arg3[%c0_91, %c0_92, %c0_93] : memref<2x32x128xf32, #tpu.memory_space<vmem>>, vector<1x32x128xf32>
    %92 = vector.shape_cast %91 : vector<1x32x128xf32> to vector<32x128xf32>
    %c1_94 = arith.constant 1 : index
    %c0_95 = arith.constant 0 : index
    %c0_96 = arith.constant 0 : index
    %93 = vector.load %arg2[%c1_94, %c0_95, %c0_96] : memref<2x32x128xf32, #tpu.memory_space<vmem>>, vector<1x32x128xf32>
    %94 = vector.shape_cast %93 : vector<1x32x128xf32> to vector<32x128xf32>
    %c1_97 = arith.constant 1 : index
    %c0_98 = arith.constant 0 : index
    %c0_99 = arith.constant 0 : index
    %95 = vector.load %arg4[%c1_97, %c0_98, %c0_99] : memref<2x1x128xf32, #tpu.memory_space<vmem>>, vector<1x1x128xf32>
    %96 = vector.shape_cast %95 : vector<1x1x128xf32> to vector<1x128xf32>
    %97 = vector.shape_cast %96 : vector<1x128xf32> to vector<1x128xf32>
    %98 = vector.broadcast %97 : vector<1x128xf32> to vector<2x128xf32>
    %c0_100 = arith.constant 0 : index
    %c0_101 = arith.constant 0 : index
    %c0_102 = arith.constant 0 : index
    %99 = vector.load %arg5[%c0_100, %c0_101, %c0_102] : memref<2x2x32xf32, #tpu.memory_space<vmem>>, vector<1x2x32xf32>
    %100 = vector.shape_cast %99 : vector<1x2x32xf32> to vector<2x32xf32>
    %c0_103 = arith.constant 0 : index
    %c0_104 = arith.constant 0 : index
    %c0_105 = arith.constant 0 : index
    %101 = vector.load %arg6[%c0_103, %c0_104, %c0_105] : memref<2x2x32xf32, #tpu.memory_space<vmem>>, vector<1x2x32xf32>
    %102 = vector.shape_cast %101 : vector<1x2x32xf32> to vector<2x32xf32>
    %c0_106 = arith.constant 0 : index
    %c0_107 = arith.constant 0 : index
    %c0_108 = arith.constant 0 : index
    %103 = vector.load %arg13[%c0_106, %c0_107, %c0_108] : memref<2x16x128xf32, #tpu.memory_space<vmem>>, vector<1x2x128xf32>
    %104 = vector.shape_cast %103 : vector<1x2x128xf32> to vector<2x128xf32>
    %cst_109 = arith.constant dense<0.000000e+00> : vector<2x128xf32>
    %105 = tpu.matmul %100, %92, %cst_109 {dimension_numbers = #tpu.dot_dimension_numbers<[1], [0], [0], [1], [0, 0, 1, 1], [], []>} : vector<2x32xf32>, vector<32x128xf32>, vector<2x128xf32> -> vector<2x128xf32>
    %106 = arith.addf %104, %105 : vector<2x128xf32>
    %107 = math.tanh %106 : vector<2x128xf32>
    %108 = vector.extract_strided_slice %107 {offsets = [0, 0], sizes = [2, 32], strides = [1, 1]} : vector<2x128xf32> to vector<2x32xf32>
    %cst_110 = arith.constant 5.000000e-01 : f32
    %109 = vector.broadcast %cst_110 : f32 to vector<2x32xf32>
    %110 = arith.mulf %109, %108 : vector<2x32xf32>
    %cst_111 = arith.constant 5.000000e-01 : f32
    %111 = vector.broadcast %cst_111 : f32 to vector<2x32xf32>
    %112 = arith.addf %110, %111 : vector<2x32xf32>
    %113 = vector.extract_strided_slice %107 {offsets = [0, 32], sizes = [2, 32], strides = [1, 1]} : vector<2x128xf32> to vector<2x32xf32>
    %cst_112 = arith.constant 5.000000e-01 : f32
    %114 = vector.broadcast %cst_112 : f32 to vector<2x32xf32>
    %115 = arith.mulf %114, %113 : vector<2x32xf32>
    %cst_113 = arith.constant 5.000000e-01 : f32
    %116 = vector.broadcast %cst_113 : f32 to vector<2x32xf32>
    %117 = arith.addf %115, %116 : vector<2x32xf32>
    %118 = vector.extract_strided_slice %107 {offsets = [0, 64], sizes = [2, 32], strides = [1, 1]} : vector<2x128xf32> to vector<2x32xf32>
    %119 = vector.extract_strided_slice %107 {offsets = [0, 96], sizes = [2, 32], strides = [1, 1]} : vector<2x128xf32> to vector<2x32xf32>
    %cst_114 = arith.constant 5.000000e-01 : f32
    %120 = vector.broadcast %cst_114 : f32 to vector<2x32xf32>
    %121 = arith.mulf %120, %119 : vector<2x32xf32>
    %cst_115 = arith.constant 5.000000e-01 : f32
    %122 = vector.broadcast %cst_115 : f32 to vector<2x32xf32>
    %123 = arith.addf %121, %122 : vector<2x32xf32>
    %124 = arith.mulf %117, %102 : vector<2x32xf32>
    %125 = arith.mulf %112, %118 : vector<2x32xf32>
    %126 = arith.addf %124, %125 : vector<2x32xf32>
    %127 = math.tanh %126 : vector<2x32xf32>
    %128 = arith.mulf %123, %127 : vector<2x32xf32>
    %cst_116 = arith.constant dense<0.000000e+00> : vector<2x128xf32>
    %129 = tpu.matmul %128, %94, %cst_116 {dimension_numbers = #tpu.dot_dimension_numbers<[1], [0], [0], [1], [0, 0, 1, 1], [], []>} : vector<2x32xf32>, vector<32x128xf32>, vector<2x128xf32> -> vector<2x128xf32>
    %130 = arith.addf %129, %98 : vector<2x128xf32>
    %c1_117 = arith.constant 1 : index
    %c0_118 = arith.constant 0 : index
    %c0_119 = arith.constant 0 : index
    %131 = vector.load %arg13[%c1_117, %c0_118, %c0_119] : memref<2x16x128xf32, #tpu.memory_space<vmem>>, vector<1x2x128xf32>
    %132 = vector.shape_cast %131 : vector<1x2x128xf32> to vector<2x128xf32>
    %133 = vector.shape_cast %130 : vector<2x128xf32> to vector<1x2x128xf32>
    tpu.vector_store %arg13[%c1_117, %c0_118, %c0_119], %133 {strides = array<i32>} : memref<2x16x128xf32, #tpu.memory_space<vmem>>, vector<1x2x128xf32>,
    %c0_120 = arith.constant 0 : index
    %c2_121 = arith.constant 2 : index
    %c0_122 = arith.constant 0 : index
    %134 = vector.load %arg13[%c0_120, %c2_121, %c0_122] : memref<2x16x128xf32, #tpu.memory_space<vmem>>, vector<1x2x128xf32>
    %135 = vector.shape_cast %134 : vector<1x2x128xf32> to vector<2x128xf32>
    %cst_123 = arith.constant dense<0.000000e+00> : vector<2x128xf32>
    %136 = tpu.matmul %128, %92, %cst_123 {dimension_numbers = #tpu.dot_dimension_numbers<[1], [0], [0], [1], [0, 0, 1, 1], [], []>} : vector<2x32xf32>, vector<32x128xf32>, vector<2x128xf32> -> vector<2x128xf32>
    %137 = arith.addf %135, %136 : vector<2x128xf32>
    %138 = math.tanh %137 : vector<2x128xf32>
    %139 = vector.extract_strided_slice %138 {offsets = [0, 0], sizes = [2, 32], strides = [1, 1]} : vector<2x128xf32> to vector<2x32xf32>
    %cst_124 = arith.constant 5.000000e-01 : f32
    %140 = vector.broadcast %cst_124 : f32 to vector<2x32xf32>
    %141 = arith.mulf %140, %139 : vector<2x32xf32>
    %cst_125 = arith.constant 5.000000e-01 : f32
    %142 = vector.broadcast %cst_125 : f32 to vector<2x32xf32>
    %143 = arith.addf %141, %142 : vector<2x32xf32>
    %144 = vector.extract_strided_slice %138 {offsets = [0, 32], sizes = [2, 32], strides = [1, 1]} : vector<2x128xf32> to vector<2x32xf32>
    %cst_126 = arith.constant 5.000000e-01 : f32
    %145 = vector.broadcast %cst_126 : f32 to vector<2x32xf32>
    %146 = arith.mulf %145, %144 : vector<2x32xf32>
    %cst_127 = arith.constant 5.000000e-01 : f32
    %147 = vector.broadcast %cst_127 : f32 to vector<2x32xf32>
    %148 = arith.addf %146, %147 : vector<2x32xf32>
    %149 = vector.extract_strided_slice %138 {offsets = [0, 64], sizes = [2, 32], strides = [1, 1]} : vector<2x128xf32> to vector<2x32xf32>
    %150 = vector.extract_strided_slice %138 {offsets = [0, 96], sizes = [2, 32], strides = [1, 1]} : vector<2x128xf32> to vector<2x32xf32>
    %cst_128 = arith.constant 5.000000e-01 : f32
    %151 = vector.broadcast %cst_128 : f32 to vector<2x32xf32>
    %152 = arith.mulf %151, %150 : vector<2x32xf32>
    %cst_129 = arith.constant 5.000000e-01 : f32
    %153 = vector.broadcast %cst_129 : f32 to vector<2x32xf32>
    %154 = arith.addf %152, %153 : vector<2x32xf32>
    %155 = arith.mulf %148, %126 : vector<2x32xf32>
    %156 = arith.mulf %143, %149 : vector<2x32xf32>
    %157 = arith.addf %155, %156 : vector<2x32xf32>
    %158 = math.tanh %157 : vector<2x32xf32>
    %159 = arith.mulf %154, %158 : vector<2x32xf32>
    %cst_130 = arith.constant dense<0.000000e+00> : vector<2x128xf32>
    %160 = tpu.matmul %159, %94, %cst_130 {dimension_numbers = #tpu.dot_dimension_numbers<[1], [0], [0], [1], [0, 0, 1, 1], [], []>} : vector<2x32xf32>, vector<32x128xf32>, vector<2x128xf32> -> vector<2x128xf32>
    %161 = arith.addf %160, %98 : vector<2x128xf32>
    %c1_131 = arith.constant 1 : index
    %c2_132 = arith.constant 2 : index
    %c0_133 = arith.constant 0 : index
    %162 = vector.load %arg13[%c1_131, %c2_132, %c0_133] : memref<2x16x128xf32, #tpu.memory_space<vmem>>, vector<1x2x128xf32>
    %163 = vector.shape_cast %162 : vector<1x2x128xf32> to vector<2x128xf32>
    %164 = vector.shape_cast %161 : vector<2x128xf32> to vector<1x2x128xf32>
    tpu.vector_store %arg13[%c1_131, %c2_132, %c0_133], %164 {strides = array<i32>} : memref<2x16x128xf32, #tpu.memory_space<vmem>>, vector<1x2x128xf32>,
    %c0_134 = arith.constant 0 : index
    %c4_135 = arith.constant 4 : index
    %c0_136 = arith.constant 0 : index
    %165 = vector.load %arg13[%c0_134, %c4_135, %c0_136] : memref<2x16x128xf32, #tpu.memory_space<vmem>>, vector<1x2x128xf32>
    %166 = vector.shape_cast %165 : vector<1x2x128xf32> to vector<2x128xf32>
    %cst_137 = arith.constant dense<0.000000e+00> : vector<2x128xf32>
    %167 = tpu.matmul %159, %92, %cst_137 {dimension_numbers = #tpu.dot_dimension_numbers<[1], [0], [0], [1], [0, 0, 1, 1], [], []>} : vector<2x32xf32>, vector<32x128xf32>, vector<2x128xf32> -> vector<2x128xf32>
    %168 = arith.addf %166, %167 : vector<2x128xf32>
    %169 = math.tanh %168 : vector<2x128xf32>
    %170 = vector.extract_strided_slice %169 {offsets = [0, 0], sizes = [2, 32], strides = [1, 1]} : vector<2x128xf32> to vector<2x32xf32>
    %cst_138 = arith.constant 5.000000e-01 : f32
    %171 = vector.broadcast %cst_138 : f32 to vector<2x32xf32>
    %172 = arith.mulf %171, %170 : vector<2x32xf32>
    %cst_139 = arith.constant 5.000000e-01 : f32
    %173 = vector.broadcast %cst_139 : f32 to vector<2x32xf32>
    %174 = arith.addf %172, %173 : vector<2x32xf32>
    %175 = vector.extract_strided_slice %169 {offsets = [0, 32], sizes = [2, 32], strides = [1, 1]} : vector<2x128xf32> to vector<2x32xf32>
    %cst_140 = arith.constant 5.000000e-01 : f32
    %176 = vector.broadcast %cst_140 : f32 to vector<2x32xf32>
    %177 = arith.mulf %176, %175 : vector<2x32xf32>
    %cst_141 = arith.constant 5.000000e-01 : f32
    %178 = vector.broadcast %cst_141 : f32 to vector<2x32xf32>
    %179 = arith.addf %177, %178 : vector<2x32xf32>
    %180 = vector.extract_strided_slice %169 {offsets = [0, 64], sizes = [2, 32], strides = [1, 1]} : vector<2x128xf32> to vector<2x32xf32>
    %181 = vector.extract_strided_slice %169 {offsets = [0, 96], sizes = [2, 32], strides = [1, 1]} : vector<2x128xf32> to vector<2x32xf32>
    %cst_142 = arith.constant 5.000000e-01 : f32
    %182 = vector.broadcast %cst_142 : f32 to vector<2x32xf32>
    %183 = arith.mulf %182, %181 : vector<2x32xf32>
    %cst_143 = arith.constant 5.000000e-01 : f32
    %184 = vector.broadcast %cst_143 : f32 to vector<2x32xf32>
    %185 = arith.addf %183, %184 : vector<2x32xf32>
    %186 = arith.mulf %179, %157 : vector<2x32xf32>
    %187 = arith.mulf %174, %180 : vector<2x32xf32>
    %188 = arith.addf %186, %187 : vector<2x32xf32>
    %189 = math.tanh %188 : vector<2x32xf32>
    %190 = arith.mulf %185, %189 : vector<2x32xf32>
    %cst_144 = arith.constant dense<0.000000e+00> : vector<2x128xf32>
    %191 = tpu.matmul %190, %94, %cst_144 {dimension_numbers = #tpu.dot_dimension_numbers<[1], [0], [0], [1], [0, 0, 1, 1], [], []>} : vector<2x32xf32>, vector<32x128xf32>, vector<2x128xf32> -> vector<2x128xf32>
    %192 = arith.addf %191, %98 : vector<2x128xf32>
    %c1_145 = arith.constant 1 : index
    %c4_146 = arith.constant 4 : index
    %c0_147 = arith.constant 0 : index
    %193 = vector.load %arg13[%c1_145, %c4_146, %c0_147] : memref<2x16x128xf32, #tpu.memory_space<vmem>>, vector<1x2x128xf32>
    %194 = vector.shape_cast %193 : vector<1x2x128xf32> to vector<2x128xf32>
    %195 = vector.shape_cast %192 : vector<2x128xf32> to vector<1x2x128xf32>
    tpu.vector_store %arg13[%c1_145, %c4_146, %c0_147], %195 {strides = array<i32>} : memref<2x16x128xf32, #tpu.memory_space<vmem>>, vector<1x2x128xf32>,
    %c0_148 = arith.constant 0 : index
    %c6_149 = arith.constant 6 : index
    %c0_150 = arith.constant 0 : index
    %196 = vector.load %arg13[%c0_148, %c6_149, %c0_150] : memref<2x16x128xf32, #tpu.memory_space<vmem>>, vector<1x2x128xf32>
    %197 = vector.shape_cast %196 : vector<1x2x128xf32> to vector<2x128xf32>
    %cst_151 = arith.constant dense<0.000000e+00> : vector<2x128xf32>
    %198 = tpu.matmul %190, %92, %cst_151 {dimension_numbers = #tpu.dot_dimension_numbers<[1], [0], [0], [1], [0, 0, 1, 1], [], []>} : vector<2x32xf32>, vector<32x128xf32>, vector<2x128xf32> -> vector<2x128xf32>
    %199 = arith.addf %197, %198 : vector<2x128xf32>
    %200 = math.tanh %199 : vector<2x128xf32>
    %201 = vector.extract_strided_slice %200 {offsets = [0, 0], sizes = [2, 32], strides = [1, 1]} : vector<2x128xf32> to vector<2x32xf32>
    %cst_152 = arith.constant 5.000000e-01 : f32
    %202 = vector.broadcast %cst_152 : f32 to vector<2x32xf32>
    %203 = arith.mulf %202, %201 : vector<2x32xf32>
    %cst_153 = arith.constant 5.000000e-01 : f32
    %204 = vector.broadcast %cst_153 : f32 to vector<2x32xf32>
    %205 = arith.addf %203, %204 : vector<2x32xf32>
    %206 = vector.extract_strided_slice %200 {offsets = [0, 32], sizes = [2, 32], strides = [1, 1]} : vector<2x128xf32> to vector<2x32xf32>
    %cst_154 = arith.constant 5.000000e-01 : f32
    %207 = vector.broadcast %cst_154 : f32 to vector<2x32xf32>
    %208 = arith.mulf %207, %206 : vector<2x32xf32>
    %cst_155 = arith.constant 5.000000e-01 : f32
    %209 = vector.broadcast %cst_155 : f32 to vector<2x32xf32>
    %210 = arith.addf %208, %209 : vector<2x32xf32>
    %211 = vector.extract_strided_slice %200 {offsets = [0, 64], sizes = [2, 32], strides = [1, 1]} : vector<2x128xf32> to vector<2x32xf32>
    %212 = vector.extract_strided_slice %200 {offsets = [0, 96], sizes = [2, 32], strides = [1, 1]} : vector<2x128xf32> to vector<2x32xf32>
    %cst_156 = arith.constant 5.000000e-01 : f32
    %213 = vector.broadcast %cst_156 : f32 to vector<2x32xf32>
    %214 = arith.mulf %213, %212 : vector<2x32xf32>
    %cst_157 = arith.constant 5.000000e-01 : f32
    %215 = vector.broadcast %cst_157 : f32 to vector<2x32xf32>
    %216 = arith.addf %214, %215 : vector<2x32xf32>
    %217 = arith.mulf %210, %188 : vector<2x32xf32>
    %218 = arith.mulf %205, %211 : vector<2x32xf32>
    %219 = arith.addf %217, %218 : vector<2x32xf32>
    %220 = math.tanh %219 : vector<2x32xf32>
    %221 = arith.mulf %216, %220 : vector<2x32xf32>
    %cst_158 = arith.constant dense<0.000000e+00> : vector<2x128xf32>
    %222 = tpu.matmul %221, %94, %cst_158 {dimension_numbers = #tpu.dot_dimension_numbers<[1], [0], [0], [1], [0, 0, 1, 1], [], []>} : vector<2x32xf32>, vector<32x128xf32>, vector<2x128xf32> -> vector<2x128xf32>
    %223 = arith.addf %222, %98 : vector<2x128xf32>
    %c1_159 = arith.constant 1 : index
    %c6_160 = arith.constant 6 : index
    %c0_161 = arith.constant 0 : index
    %224 = vector.load %arg13[%c1_159, %c6_160, %c0_161] : memref<2x16x128xf32, #tpu.memory_space<vmem>>, vector<1x2x128xf32>
    %225 = vector.shape_cast %224 : vector<1x2x128xf32> to vector<2x128xf32>
    %226 = vector.shape_cast %223 : vector<2x128xf32> to vector<1x2x128xf32>
    tpu.vector_store %arg13[%c1_159, %c6_160, %c0_161], %226 {strides = array<i32>} : memref<2x16x128xf32, #tpu.memory_space<vmem>>, vector<1x2x128xf32>,
    %c0_162 = arith.constant 0 : index
    %c8_163 = arith.constant 8 : index
    %c0_164 = arith.constant 0 : index
    %227 = vector.load %arg13[%c0_162, %c8_163, %c0_164] : memref<2x16x128xf32, #tpu.memory_space<vmem>>, vector<1x2x128xf32>
    %228 = vector.shape_cast %227 : vector<1x2x128xf32> to vector<2x128xf32>
    %cst_165 = arith.constant dense<0.000000e+00> : vector<2x128xf32>
    %229 = tpu.matmul %221, %92, %cst_165 {dimension_numbers = #tpu.dot_dimension_numbers<[1], [0], [0], [1], [0, 0, 1, 1], [], []>} : vector<2x32xf32>, vector<32x128xf32>, vector<2x128xf32> -> vector<2x128xf32>
    %230 = arith.addf %228, %229 : vector<2x128xf32>
    %231 = math.tanh %230 : vector<2x128xf32>
    %232 = vector.extract_strided_slice %231 {offsets = [0, 0], sizes = [2, 32], strides = [1, 1]} : vector<2x128xf32> to vector<2x32xf32>
    %cst_166 = arith.constant 5.000000e-01 : f32
    %233 = vector.broadcast %cst_166 : f32 to vector<2x32xf32>
    %234 = arith.mulf %233, %232 : vector<2x32xf32>
    %cst_167 = arith.constant 5.000000e-01 : f32
    %235 = vector.broadcast %cst_167 : f32 to vector<2x32xf32>
    %236 = arith.addf %234, %235 : vector<2x32xf32>
    %237 = vector.extract_strided_slice %231 {offsets = [0, 32], sizes = [2, 32], strides = [1, 1]} : vector<2x128xf32> to vector<2x32xf32>
    %cst_168 = arith.constant 5.000000e-01 : f32
    %238 = vector.broadcast %cst_168 : f32 to vector<2x32xf32>
    %239 = arith.mulf %238, %237 : vector<2x32xf32>
    %cst_169 = arith.constant 5.000000e-01 : f32
    %240 = vector.broadcast %cst_169 : f32 to vector<2x32xf32>
    %241 = arith.addf %239, %240 : vector<2x32xf32>
    %242 = vector.extract_strided_slice %231 {offsets = [0, 64], sizes = [2, 32], strides = [1, 1]} : vector<2x128xf32> to vector<2x32xf32>
    %243 = vector.extract_strided_slice %231 {offsets = [0, 96], sizes = [2, 32], strides = [1, 1]} : vector<2x128xf32> to vector<2x32xf32>
    %cst_170 = arith.constant 5.000000e-01 : f32
    %244 = vector.broadcast %cst_170 : f32 to vector<2x32xf32>
    %245 = arith.mulf %244, %243 : vector<2x32xf32>
    %cst_171 = arith.constant 5.000000e-01 : f32
    %246 = vector.broadcast %cst_171 : f32 to vector<2x32xf32>
    %247 = arith.addf %245, %246 : vector<2x32xf32>
    %248 = arith.mulf %241, %219 : vector<2x32xf32>
    %249 = arith.mulf %236, %242 : vector<2x32xf32>
    %250 = arith.addf %248, %249 : vector<2x32xf32>
    %251 = math.tanh %250 : vector<2x32xf32>
    %252 = arith.mulf %247, %251 : vector<2x32xf32>
    %cst_172 = arith.constant dense<0.000000e+00> : vector<2x128xf32>
    %253 = tpu.matmul %252, %94, %cst_172 {dimension_numbers = #tpu.dot_dimension_numbers<[1], [0], [0], [1], [0, 0, 1, 1], [], []>} : vector<2x32xf32>, vector<32x128xf32>, vector<2x128xf32> -> vector<2x128xf32>
    %254 = arith.addf %253, %98 : vector<2x128xf32>
    %c1_173 = arith.constant 1 : index
    %c8_174 = arith.constant 8 : index
    %c0_175 = arith.constant 0 : index
    %255 = vector.load %arg13[%c1_173, %c8_174, %c0_175] : memref<2x16x128xf32, #tpu.memory_space<vmem>>, vector<1x2x128xf32>
    %256 = vector.shape_cast %255 : vector<1x2x128xf32> to vector<2x128xf32>
    %257 = vector.shape_cast %254 : vector<2x128xf32> to vector<1x2x128xf32>
    tpu.vector_store %arg13[%c1_173, %c8_174, %c0_175], %257 {strides = array<i32>} : memref<2x16x128xf32, #tpu.memory_space<vmem>>, vector<1x2x128xf32>,
    %c0_176 = arith.constant 0 : index
    %c10_177 = arith.constant 10 : index
    %c0_178 = arith.constant 0 : index
    %258 = vector.load %arg13[%c0_176, %c10_177, %c0_178] : memref<2x16x128xf32, #tpu.memory_space<vmem>>, vector<1x2x128xf32>
    %259 = vector.shape_cast %258 : vector<1x2x128xf32> to vector<2x128xf32>
    %cst_179 = arith.constant dense<0.000000e+00> : vector<2x128xf32>
    %260 = tpu.matmul %252, %92, %cst_179 {dimension_numbers = #tpu.dot_dimension_numbers<[1], [0], [0], [1], [0, 0, 1, 1], [], []>} : vector<2x32xf32>, vector<32x128xf32>, vector<2x128xf32> -> vector<2x128xf32>
    %261 = arith.addf %259, %260 : vector<2x128xf32>
    %262 = math.tanh %261 : vector<2x128xf32>
    %263 = vector.extract_strided_slice %262 {offsets = [0, 0], sizes = [2, 32], strides = [1, 1]} : vector<2x128xf32> to vector<2x32xf32>
    %cst_180 = arith.constant 5.000000e-01 : f32
    %264 = vector.broadcast %cst_180 : f32 to vector<2x32xf32>
    %265 = arith.mulf %264, %263 : vector<2x32xf32>
    %cst_181 = arith.constant 5.000000e-01 : f32
    %266 = vector.broadcast %cst_181 : f32 to vector<2x32xf32>
    %267 = arith.addf %265, %266 : vector<2x32xf32>
    %268 = vector.extract_strided_slice %262 {offsets = [0, 32], sizes = [2, 32], strides = [1, 1]} : vector<2x128xf32> to vector<2x32xf32>
    %cst_182 = arith.constant 5.000000e-01 : f32
    %269 = vector.broadcast %cst_182 : f32 to vector<2x32xf32>
    %270 = arith.mulf %269, %268 : vector<2x32xf32>
    %cst_183 = arith.constant 5.000000e-01 : f32
    %271 = vector.broadcast %cst_183 : f32 to vector<2x32xf32>
    %272 = arith.addf %270, %271 : vector<2x32xf32>
    %273 = vector.extract_strided_slice %262 {offsets = [0, 64], sizes = [2, 32], strides = [1, 1]} : vector<2x128xf32> to vector<2x32xf32>
    %274 = vector.extract_strided_slice %262 {offsets = [0, 96], sizes = [2, 32], strides = [1, 1]} : vector<2x128xf32> to vector<2x32xf32>
    %cst_184 = arith.constant 5.000000e-01 : f32
    %275 = vector.broadcast %cst_184 : f32 to vector<2x32xf32>
    %276 = arith.mulf %275, %274 : vector<2x32xf32>
    %cst_185 = arith.constant 5.000000e-01 : f32
    %277 = vector.broadcast %cst_185 : f32 to vector<2x32xf32>
    %278 = arith.addf %276, %277 : vector<2x32xf32>
    %279 = arith.mulf %272, %250 : vector<2x32xf32>
    %280 = arith.mulf %267, %273 : vector<2x32xf32>
    %281 = arith.addf %279, %280 : vector<2x32xf32>
    %282 = math.tanh %281 : vector<2x32xf32>
    %283 = arith.mulf %278, %282 : vector<2x32xf32>
    %cst_186 = arith.constant dense<0.000000e+00> : vector<2x128xf32>
    %284 = tpu.matmul %283, %94, %cst_186 {dimension_numbers = #tpu.dot_dimension_numbers<[1], [0], [0], [1], [0, 0, 1, 1], [], []>} : vector<2x32xf32>, vector<32x128xf32>, vector<2x128xf32> -> vector<2x128xf32>
    %285 = arith.addf %284, %98 : vector<2x128xf32>
    %c1_187 = arith.constant 1 : index
    %c10_188 = arith.constant 10 : index
    %c0_189 = arith.constant 0 : index
    %286 = vector.load %arg13[%c1_187, %c10_188, %c0_189] : memref<2x16x128xf32, #tpu.memory_space<vmem>>, vector<1x2x128xf32>
    %287 = vector.shape_cast %286 : vector<1x2x128xf32> to vector<2x128xf32>
    %288 = vector.shape_cast %285 : vector<2x128xf32> to vector<1x2x128xf32>
    tpu.vector_store %arg13[%c1_187, %c10_188, %c0_189], %288 {strides = array<i32>} : memref<2x16x128xf32, #tpu.memory_space<vmem>>, vector<1x2x128xf32>,
    %c0_190 = arith.constant 0 : index
    %c12_191 = arith.constant 12 : index
    %c0_192 = arith.constant 0 : index
    %289 = vector.load %arg13[%c0_190, %c12_191, %c0_192] : memref<2x16x128xf32, #tpu.memory_space<vmem>>, vector<1x2x128xf32>
    %290 = vector.shape_cast %289 : vector<1x2x128xf32> to vector<2x128xf32>
    %cst_193 = arith.constant dense<0.000000e+00> : vector<2x128xf32>
    %291 = tpu.matmul %283, %92, %cst_193 {dimension_numbers = #tpu.dot_dimension_numbers<[1], [0], [0], [1], [0, 0, 1, 1], [], []>} : vector<2x32xf32>, vector<32x128xf32>, vector<2x128xf32> -> vector<2x128xf32>
    %292 = arith.addf %290, %291 : vector<2x128xf32>
    %293 = math.tanh %292 : vector<2x128xf32>
    %294 = vector.extract_strided_slice %293 {offsets = [0, 0], sizes = [2, 32], strides = [1, 1]} : vector<2x128xf32> to vector<2x32xf32>
    %cst_194 = arith.constant 5.000000e-01 : f32
    %295 = vector.broadcast %cst_194 : f32 to vector<2x32xf32>
    %296 = arith.mulf %295, %294 : vector<2x32xf32>
    %cst_195 = arith.constant 5.000000e-01 : f32
    %297 = vector.broadcast %cst_195 : f32 to vector<2x32xf32>
    %298 = arith.addf %296, %297 : vector<2x32xf32>
    %299 = vector.extract_strided_slice %293 {offsets = [0, 32], sizes = [2, 32], strides = [1, 1]} : vector<2x128xf32> to vector<2x32xf32>
    %cst_196 = arith.constant 5.000000e-01 : f32
    %300 = vector.broadcast %cst_196 : f32 to vector<2x32xf32>
    %301 = arith.mulf %300, %299 : vector<2x32xf32>
    %cst_197 = arith.constant 5.000000e-01 : f32
    %302 = vector.broadcast %cst_197 : f32 to vector<2x32xf32>
    %303 = arith.addf %301, %302 : vector<2x32xf32>
    %304 = vector.extract_strided_slice %293 {offsets = [0, 64], sizes = [2, 32], strides = [1, 1]} : vector<2x128xf32> to vector<2x32xf32>
    %305 = vector.extract_strided_slice %293 {offsets = [0, 96], sizes = [2, 32], strides = [1, 1]} : vector<2x128xf32> to vector<2x32xf32>
    %cst_198 = arith.constant 5.000000e-01 : f32
    %306 = vector.broadcast %cst_198 : f32 to vector<2x32xf32>
    %307 = arith.mulf %306, %305 : vector<2x32xf32>
    %cst_199 = arith.constant 5.000000e-01 : f32
    %308 = vector.broadcast %cst_199 : f32 to vector<2x32xf32>
    %309 = arith.addf %307, %308 : vector<2x32xf32>
    %310 = arith.mulf %303, %281 : vector<2x32xf32>
    %311 = arith.mulf %298, %304 : vector<2x32xf32>
    %312 = arith.addf %310, %311 : vector<2x32xf32>
    %313 = math.tanh %312 : vector<2x32xf32>
    %314 = arith.mulf %309, %313 : vector<2x32xf32>
    %cst_200 = arith.constant dense<0.000000e+00> : vector<2x128xf32>
    %315 = tpu.matmul %314, %94, %cst_200 {dimension_numbers = #tpu.dot_dimension_numbers<[1], [0], [0], [1], [0, 0, 1, 1], [], []>} : vector<2x32xf32>, vector<32x128xf32>, vector<2x128xf32> -> vector<2x128xf32>
    %316 = arith.addf %315, %98 : vector<2x128xf32>
    %c1_201 = arith.constant 1 : index
    %c12_202 = arith.constant 12 : index
    %c0_203 = arith.constant 0 : index
    %317 = vector.load %arg13[%c1_201, %c12_202, %c0_203] : memref<2x16x128xf32, #tpu.memory_space<vmem>>, vector<1x2x128xf32>
    %318 = vector.shape_cast %317 : vector<1x2x128xf32> to vector<2x128xf32>
    %319 = vector.shape_cast %316 : vector<2x128xf32> to vector<1x2x128xf32>
    tpu.vector_store %arg13[%c1_201, %c12_202, %c0_203], %319 {strides = array<i32>} : memref<2x16x128xf32, #tpu.memory_space<vmem>>, vector<1x2x128xf32>,
    %c0_204 = arith.constant 0 : index
    %c14_205 = arith.constant 14 : index
    %c0_206 = arith.constant 0 : index
    %320 = vector.load %arg13[%c0_204, %c14_205, %c0_206] : memref<2x16x128xf32, #tpu.memory_space<vmem>>, vector<1x2x128xf32>
    %321 = vector.shape_cast %320 : vector<1x2x128xf32> to vector<2x128xf32>
    %cst_207 = arith.constant dense<0.000000e+00> : vector<2x128xf32>
    %322 = tpu.matmul %314, %92, %cst_207 {dimension_numbers = #tpu.dot_dimension_numbers<[1], [0], [0], [1], [0, 0, 1, 1], [], []>} : vector<2x32xf32>, vector<32x128xf32>, vector<2x128xf32> -> vector<2x128xf32>
    %323 = arith.addf %321, %322 : vector<2x128xf32>
    %324 = math.tanh %323 : vector<2x128xf32>
    %325 = vector.extract_strided_slice %324 {offsets = [0, 0], sizes = [2, 32], strides = [1, 1]} : vector<2x128xf32> to vector<2x32xf32>
    %cst_208 = arith.constant 5.000000e-01 : f32
    %326 = vector.broadcast %cst_208 : f32 to vector<2x32xf32>
    %327 = arith.mulf %326, %325 : vector<2x32xf32>
    %cst_209 = arith.constant 5.000000e-01 : f32
    %328 = vector.broadcast %cst_209 : f32 to vector<2x32xf32>
    %329 = arith.addf %327, %328 : vector<2x32xf32>
    %330 = vector.extract_strided_slice %324 {offsets = [0, 32], sizes = [2, 32], strides = [1, 1]} : vector<2x128xf32> to vector<2x32xf32>
    %cst_210 = arith.constant 5.000000e-01 : f32
    %331 = vector.broadcast %cst_210 : f32 to vector<2x32xf32>
    %332 = arith.mulf %331, %330 : vector<2x32xf32>
    %cst_211 = arith.constant 5.000000e-01 : f32
    %333 = vector.broadcast %cst_211 : f32 to vector<2x32xf32>
    %334 = arith.addf %332, %333 : vector<2x32xf32>
    %335 = vector.extract_strided_slice %324 {offsets = [0, 64], sizes = [2, 32], strides = [1, 1]} : vector<2x128xf32> to vector<2x32xf32>
    %336 = vector.extract_strided_slice %324 {offsets = [0, 96], sizes = [2, 32], strides = [1, 1]} : vector<2x128xf32> to vector<2x32xf32>
    %cst_212 = arith.constant 5.000000e-01 : f32
    %337 = vector.broadcast %cst_212 : f32 to vector<2x32xf32>
    %338 = arith.mulf %337, %336 : vector<2x32xf32>
    %cst_213 = arith.constant 5.000000e-01 : f32
    %339 = vector.broadcast %cst_213 : f32 to vector<2x32xf32>
    %340 = arith.addf %338, %339 : vector<2x32xf32>
    %341 = arith.mulf %334, %312 : vector<2x32xf32>
    %342 = arith.mulf %329, %335 : vector<2x32xf32>
    %343 = arith.addf %341, %342 : vector<2x32xf32>
    %344 = math.tanh %343 : vector<2x32xf32>
    %345 = arith.mulf %340, %344 : vector<2x32xf32>
    %cst_214 = arith.constant dense<0.000000e+00> : vector<2x128xf32>
    %346 = tpu.matmul %345, %94, %cst_214 {dimension_numbers = #tpu.dot_dimension_numbers<[1], [0], [0], [1], [0, 0, 1, 1], [], []>} : vector<2x32xf32>, vector<32x128xf32>, vector<2x128xf32> -> vector<2x128xf32>
    %347 = arith.addf %346, %98 : vector<2x128xf32>
    %c1_215 = arith.constant 1 : index
    %c14_216 = arith.constant 14 : index
    %c0_217 = arith.constant 0 : index
    %348 = vector.load %arg13[%c1_215, %c14_216, %c0_217] : memref<2x16x128xf32, #tpu.memory_space<vmem>>, vector<1x2x128xf32>
    %349 = vector.shape_cast %348 : vector<1x2x128xf32> to vector<2x128xf32>
    %350 = vector.shape_cast %347 : vector<2x128xf32> to vector<1x2x128xf32>
    tpu.vector_store %arg13[%c1_215, %c14_216, %c0_217], %350 {strides = array<i32>} : memref<2x16x128xf32, #tpu.memory_space<vmem>>, vector<1x2x128xf32>,
    %c0_218 = arith.constant 0 : index
    %c0_219 = arith.constant 0 : index
    %c0_220 = arith.constant 0 : index
    %351 = vector.load %arg10[%c0_218, %c0_219, %c0_220] : memref<2x2x32xf32, #tpu.memory_space<vmem>>, vector<1x2x32xf32>
    %352 = vector.shape_cast %351 : vector<1x2x32xf32> to vector<2x32xf32>
    %353 = vector.shape_cast %345 : vector<2x32xf32> to vector<1x2x32xf32>
    tpu.vector_store %arg10[%c0_218, %c0_219, %c0_220], %353 {strides = array<i32>} : memref<2x2x32xf32, #tpu.memory_space<vmem>>, vector<1x2x32xf32>,
    %c0_221 = arith.constant 0 : index
    %c0_222 = arith.constant 0 : index
    %c0_223 = arith.constant 0 : index
    %354 = vector.load %arg11[%c0_221, %c0_222, %c0_223] : memref<2x2x32xf32, #tpu.memory_space<vmem>>, vector<1x2x32xf32>
    %355 = vector.shape_cast %354 : vector<1x2x32xf32> to vector<2x32xf32>
    %356 = vector.shape_cast %343 : vector<2x32xf32> to vector<1x2x32xf32>
    tpu.vector_store %arg11[%c0_221, %c0_222, %c0_223], %356 {strides = array<i32>} : memref<2x2x32xf32, #tpu.memory_space<vmem>>, vector<1x2x32xf32>,
    %c1_224 = arith.constant 1 : index
    %c0_225 = arith.constant 0 : index
    %c0_226 = arith.constant 0 : index
    %357 = vector.load %arg3[%c1_224, %c0_225, %c0_226] : memref<2x32x128xf32, #tpu.memory_space<vmem>>, vector<1x32x128xf32>
    %358 = vector.shape_cast %357 : vector<1x32x128xf32> to vector<32x128xf32>
    %c1_227 = arith.constant 1 : index
    %c0_228 = arith.constant 0 : index
    %c0_229 = arith.constant 0 : index
    %359 = vector.load %arg5[%c1_227, %c0_228, %c0_229] : memref<2x2x32xf32, #tpu.memory_space<vmem>>, vector<1x2x32xf32>
    %360 = vector.shape_cast %359 : vector<1x2x32xf32> to vector<2x32xf32>
    %c1_230 = arith.constant 1 : index
    %c0_231 = arith.constant 0 : index
    %c0_232 = arith.constant 0 : index
    %361 = vector.load %arg6[%c1_230, %c0_231, %c0_232] : memref<2x2x32xf32, #tpu.memory_space<vmem>>, vector<1x2x32xf32>
    %362 = vector.shape_cast %361 : vector<1x2x32xf32> to vector<2x32xf32>
    %c1_233 = arith.constant 1 : index
    %c0_234 = arith.constant 0 : index
    %c0_235 = arith.constant 0 : index
    %363 = vector.load %arg13[%c1_233, %c0_234, %c0_235] : memref<2x16x128xf32, #tpu.memory_space<vmem>>, vector<1x2x128xf32>
    %364 = vector.shape_cast %363 : vector<1x2x128xf32> to vector<2x128xf32>
    %cst_236 = arith.constant dense<0.000000e+00> : vector<2x128xf32>
    %365 = tpu.matmul %360, %358, %cst_236 {dimension_numbers = #tpu.dot_dimension_numbers<[1], [0], [0], [1], [0, 0, 1, 1], [], []>} : vector<2x32xf32>, vector<32x128xf32>, vector<2x128xf32> -> vector<2x128xf32>
    %366 = arith.addf %364, %365 : vector<2x128xf32>
    %367 = math.tanh %366 : vector<2x128xf32>
    %368 = vector.extract_strided_slice %367 {offsets = [0, 0], sizes = [2, 32], strides = [1, 1]} : vector<2x128xf32> to vector<2x32xf32>
    %cst_237 = arith.constant 5.000000e-01 : f32
    %369 = vector.broadcast %cst_237 : f32 to vector<2x32xf32>
    %370 = arith.mulf %369, %368 : vector<2x32xf32>
    %cst_238 = arith.constant 5.000000e-01 : f32
    %371 = vector.broadcast %cst_238 : f32 to vector<2x32xf32>
    %372 = arith.addf %370, %371 : vector<2x32xf32>
    %373 = vector.extract_strided_slice %367 {offsets = [0, 32], sizes = [2, 32], strides = [1, 1]} : vector<2x128xf32> to vector<2x32xf32>
    %cst_239 = arith.constant 5.000000e-01 : f32
    %374 = vector.broadcast %cst_239 : f32 to vector<2x32xf32>
    %375 = arith.mulf %374, %373 : vector<2x32xf32>
    %cst_240 = arith.constant 5.000000e-01 : f32
    %376 = vector.broadcast %cst_240 : f32 to vector<2x32xf32>
    %377 = arith.addf %375, %376 : vector<2x32xf32>
    %378 = vector.extract_strided_slice %367 {offsets = [0, 64], sizes = [2, 32], strides = [1, 1]} : vector<2x128xf32> to vector<2x32xf32>
    %379 = vector.extract_strided_slice %367 {offsets = [0, 96], sizes = [2, 32], strides = [1, 1]} : vector<2x128xf32> to vector<2x32xf32>
    %cst_241 = arith.constant 5.000000e-01 : f32
    %380 = vector.broadcast %cst_241 : f32 to vector<2x32xf32>
    %381 = arith.mulf %380, %379 : vector<2x32xf32>
    %cst_242 = arith.constant 5.000000e-01 : f32
    %382 = vector.broadcast %cst_242 : f32 to vector<2x32xf32>
    %383 = arith.addf %381, %382 : vector<2x32xf32>
    %384 = arith.mulf %377, %362 : vector<2x32xf32>
    %385 = arith.mulf %372, %378 : vector<2x32xf32>
    %386 = arith.addf %384, %385 : vector<2x32xf32>
    %387 = math.tanh %386 : vector<2x32xf32>
    %388 = arith.mulf %383, %387 : vector<2x32xf32>
    %c1_243 = arith.constant 1 : index
    %c2_244 = arith.constant 2 : index
    %c0_245 = arith.constant 0 : index
    %389 = vector.load %arg13[%c1_243, %c2_244, %c0_245] : memref<2x16x128xf32, #tpu.memory_space<vmem>>, vector<1x2x128xf32>
    %390 = vector.shape_cast %389 : vector<1x2x128xf32> to vector<2x128xf32>
    %cst_246 = arith.constant dense<0.000000e+00> : vector<2x128xf32>
    %391 = tpu.matmul %388, %358, %cst_246 {dimension_numbers = #tpu.dot_dimension_numbers<[1], [0], [0], [1], [0, 0, 1, 1], [], []>} : vector<2x32xf32>, vector<32x128xf32>, vector<2x128xf32> -> vector<2x128xf32>
    %392 = arith.addf %390, %391 : vector<2x128xf32>
    %393 = math.tanh %392 : vector<2x128xf32>
    %394 = vector.extract_strided_slice %393 {offsets = [0, 0], sizes = [2, 32], strides = [1, 1]} : vector<2x128xf32> to vector<2x32xf32>
    %cst_247 = arith.constant 5.000000e-01 : f32
    %395 = vector.broadcast %cst_247 : f32 to vector<2x32xf32>
    %396 = arith.mulf %395, %394 : vector<2x32xf32>
    %cst_248 = arith.constant 5.000000e-01 : f32
    %397 = vector.broadcast %cst_248 : f32 to vector<2x32xf32>
    %398 = arith.addf %396, %397 : vector<2x32xf32>
    %399 = vector.extract_strided_slice %393 {offsets = [0, 32], sizes = [2, 32], strides = [1, 1]} : vector<2x128xf32> to vector<2x32xf32>
    %cst_249 = arith.constant 5.000000e-01 : f32
    %400 = vector.broadcast %cst_249 : f32 to vector<2x32xf32>
    %401 = arith.mulf %400, %399 : vector<2x32xf32>
    %cst_250 = arith.constant 5.000000e-01 : f32
    %402 = vector.broadcast %cst_250 : f32 to vector<2x32xf32>
    %403 = arith.addf %401, %402 : vector<2x32xf32>
    %404 = vector.extract_strided_slice %393 {offsets = [0, 64], sizes = [2, 32], strides = [1, 1]} : vector<2x128xf32> to vector<2x32xf32>
    %405 = vector.extract_strided_slice %393 {offsets = [0, 96], sizes = [2, 32], strides = [1, 1]} : vector<2x128xf32> to vector<2x32xf32>
    %cst_251 = arith.constant 5.000000e-01 : f32
    %406 = vector.broadcast %cst_251 : f32 to vector<2x32xf32>
    %407 = arith.mulf %406, %405 : vector<2x32xf32>
    %cst_252 = arith.constant 5.000000e-01 : f32
    %408 = vector.broadcast %cst_252 : f32 to vector<2x32xf32>
    %409 = arith.addf %407, %408 : vector<2x32xf32>
    %410 = arith.mulf %403, %386 : vector<2x32xf32>
    %411 = arith.mulf %398, %404 : vector<2x32xf32>
    %412 = arith.addf %410, %411 : vector<2x32xf32>
    %413 = math.tanh %412 : vector<2x32xf32>
    %414 = arith.mulf %409, %413 : vector<2x32xf32>
    %c1_253 = arith.constant 1 : index
    %c4_254 = arith.constant 4 : index
    %c0_255 = arith.constant 0 : index
    %415 = vector.load %arg13[%c1_253, %c4_254, %c0_255] : memref<2x16x128xf32, #tpu.memory_space<vmem>>, vector<1x2x128xf32>
    %416 = vector.shape_cast %415 : vector<1x2x128xf32> to vector<2x128xf32>
    %cst_256 = arith.constant dense<0.000000e+00> : vector<2x128xf32>
    %417 = tpu.matmul %414, %358, %cst_256 {dimension_numbers = #tpu.dot_dimension_numbers<[1], [0], [0], [1], [0, 0, 1, 1], [], []>} : vector<2x32xf32>, vector<32x128xf32>, vector<2x128xf32> -> vector<2x128xf32>
    %418 = arith.addf %416, %417 : vector<2x128xf32>
    %419 = math.tanh %418 : vector<2x128xf32>
    %420 = vector.extract_strided_slice %419 {offsets = [0, 0], sizes = [2, 32], strides = [1, 1]} : vector<2x128xf32> to vector<2x32xf32>
    %cst_257 = arith.constant 5.000000e-01 : f32
    %421 = vector.broadcast %cst_257 : f32 to vector<2x32xf32>
    %422 = arith.mulf %421, %420 : vector<2x32xf32>
    %cst_258 = arith.constant 5.000000e-01 : f32
    %423 = vector.broadcast %cst_258 : f32 to vector<2x32xf32>
    %424 = arith.addf %422, %423 : vector<2x32xf32>
    %425 = vector.extract_strided_slice %419 {offsets = [0, 32], sizes = [2, 32], strides = [1, 1]} : vector<2x128xf32> to vector<2x32xf32>
    %cst_259 = arith.constant 5.000000e-01 : f32
    %426 = vector.broadcast %cst_259 : f32 to vector<2x32xf32>
    %427 = arith.mulf %426, %425 : vector<2x32xf32>
    %cst_260 = arith.constant 5.000000e-01 : f32
    %428 = vector.broadcast %cst_260 : f32 to vector<2x32xf32>
    %429 = arith.addf %427, %428 : vector<2x32xf32>
    %430 = vector.extract_strided_slice %419 {offsets = [0, 64], sizes = [2, 32], strides = [1, 1]} : vector<2x128xf32> to vector<2x32xf32>
    %431 = vector.extract_strided_slice %419 {offsets = [0, 96], sizes = [2, 32], strides = [1, 1]} : vector<2x128xf32> to vector<2x32xf32>
    %cst_261 = arith.constant 5.000000e-01 : f32
    %432 = vector.broadcast %cst_261 : f32 to vector<2x32xf32>
    %433 = arith.mulf %432, %431 : vector<2x32xf32>
    %cst_262 = arith.constant 5.000000e-01 : f32
    %434 = vector.broadcast %cst_262 : f32 to vector<2x32xf32>
    %435 = arith.addf %433, %434 : vector<2x32xf32>
    %436 = arith.mulf %429, %412 : vector<2x32xf32>
    %437 = arith.mulf %424, %430 : vector<2x32xf32>
    %438 = arith.addf %436, %437 : vector<2x32xf32>
    %439 = math.tanh %438 : vector<2x32xf32>
    %440 = arith.mulf %435, %439 : vector<2x32xf32>
    %c1_263 = arith.constant 1 : index
    %c6_264 = arith.constant 6 : index
    %c0_265 = arith.constant 0 : index
    %441 = vector.load %arg13[%c1_263, %c6_264, %c0_265] : memref<2x16x128xf32, #tpu.memory_space<vmem>>, vector<1x2x128xf32>
    %442 = vector.shape_cast %441 : vector<1x2x128xf32> to vector<2x128xf32>
    %cst_266 = arith.constant dense<0.000000e+00> : vector<2x128xf32>
    %443 = tpu.matmul %440, %358, %cst_266 {dimension_numbers = #tpu.dot_dimension_numbers<[1], [0], [0], [1], [0, 0, 1, 1], [], []>} : vector<2x32xf32>, vector<32x128xf32>, vector<2x128xf32> -> vector<2x128xf32>
    %444 = arith.addf %442, %443 : vector<2x128xf32>
    %445 = math.tanh %444 : vector<2x128xf32>
    %446 = vector.extract_strided_slice %445 {offsets = [0, 0], sizes = [2, 32], strides = [1, 1]} : vector<2x128xf32> to vector<2x32xf32>
    %cst_267 = arith.constant 5.000000e-01 : f32
    %447 = vector.broadcast %cst_267 : f32 to vector<2x32xf32>
    %448 = arith.mulf %447, %446 : vector<2x32xf32>
    %cst_268 = arith.constant 5.000000e-01 : f32
    %449 = vector.broadcast %cst_268 : f32 to vector<2x32xf32>
    %450 = arith.addf %448, %449 : vector<2x32xf32>
    %451 = vector.extract_strided_slice %445 {offsets = [0, 32], sizes = [2, 32], strides = [1, 1]} : vector<2x128xf32> to vector<2x32xf32>
    %cst_269 = arith.constant 5.000000e-01 : f32
    %452 = vector.broadcast %cst_269 : f32 to vector<2x32xf32>
    %453 = arith.mulf %452, %451 : vector<2x32xf32>
    %cst_270 = arith.constant 5.000000e-01 : f32
    %454 = vector.broadcast %cst_270 : f32 to vector<2x32xf32>
    %455 = arith.addf %453, %454 : vector<2x32xf32>
    %456 = vector.extract_strided_slice %445 {offsets = [0, 64], sizes = [2, 32], strides = [1, 1]} : vector<2x128xf32> to vector<2x32xf32>
    %457 = vector.extract_strided_slice %445 {offsets = [0, 96], sizes = [2, 32], strides = [1, 1]} : vector<2x128xf32> to vector<2x32xf32>
    %cst_271 = arith.constant 5.000000e-01 : f32
    %458 = vector.broadcast %cst_271 : f32 to vector<2x32xf32>
    %459 = arith.mulf %458, %457 : vector<2x32xf32>
    %cst_272 = arith.constant 5.000000e-01 : f32
    %460 = vector.broadcast %cst_272 : f32 to vector<2x32xf32>
    %461 = arith.addf %459, %460 : vector<2x32xf32>
    %462 = arith.mulf %455, %438 : vector<2x32xf32>
    %463 = arith.mulf %450, %456 : vector<2x32xf32>
    %464 = arith.addf %462, %463 : vector<2x32xf32>
    %465 = math.tanh %464 : vector<2x32xf32>
    %466 = arith.mulf %461, %465 : vector<2x32xf32>
    %c1_273 = arith.constant 1 : index
    %c8_274 = arith.constant 8 : index
    %c0_275 = arith.constant 0 : index
    %467 = vector.load %arg13[%c1_273, %c8_274, %c0_275] : memref<2x16x128xf32, #tpu.memory_space<vmem>>, vector<1x2x128xf32>
    %468 = vector.shape_cast %467 : vector<1x2x128xf32> to vector<2x128xf32>
    %cst_276 = arith.constant dense<0.000000e+00> : vector<2x128xf32>
    %469 = tpu.matmul %466, %358, %cst_276 {dimension_numbers = #tpu.dot_dimension_numbers<[1], [0], [0], [1], [0, 0, 1, 1], [], []>} : vector<2x32xf32>, vector<32x128xf32>, vector<2x128xf32> -> vector<2x128xf32>
    %470 = arith.addf %468, %469 : vector<2x128xf32>
    %471 = math.tanh %470 : vector<2x128xf32>
    %472 = vector.extract_strided_slice %471 {offsets = [0, 0], sizes = [2, 32], strides = [1, 1]} : vector<2x128xf32> to vector<2x32xf32>
    %cst_277 = arith.constant 5.000000e-01 : f32
    %473 = vector.broadcast %cst_277 : f32 to vector<2x32xf32>
    %474 = arith.mulf %473, %472 : vector<2x32xf32>
    %cst_278 = arith.constant 5.000000e-01 : f32
    %475 = vector.broadcast %cst_278 : f32 to vector<2x32xf32>
    %476 = arith.addf %474, %475 : vector<2x32xf32>
    %477 = vector.extract_strided_slice %471 {offsets = [0, 32], sizes = [2, 32], strides = [1, 1]} : vector<2x128xf32> to vector<2x32xf32>
    %cst_279 = arith.constant 5.000000e-01 : f32
    %478 = vector.broadcast %cst_279 : f32 to vector<2x32xf32>
    %479 = arith.mulf %478, %477 : vector<2x32xf32>
    %cst_280 = arith.constant 5.000000e-01 : f32
    %480 = vector.broadcast %cst_280 : f32 to vector<2x32xf32>
    %481 = arith.addf %479, %480 : vector<2x32xf32>
    %482 = vector.extract_strided_slice %471 {offsets = [0, 64], sizes = [2, 32], strides = [1, 1]} : vector<2x128xf32> to vector<2x32xf32>
    %483 = vector.extract_strided_slice %471 {offsets = [0, 96], sizes = [2, 32], strides = [1, 1]} : vector<2x128xf32> to vector<2x32xf32>
    %cst_281 = arith.constant 5.000000e-01 : f32
    %484 = vector.broadcast %cst_281 : f32 to vector<2x32xf32>
    %485 = arith.mulf %484, %483 : vector<2x32xf32>
    %cst_282 = arith.constant 5.000000e-01 : f32
    %486 = vector.broadcast %cst_282 : f32 to vector<2x32xf32>
    %487 = arith.addf %485, %486 : vector<2x32xf32>
    %488 = arith.mulf %481, %464 : vector<2x32xf32>
    %489 = arith.mulf %476, %482 : vector<2x32xf32>
    %490 = arith.addf %488, %489 : vector<2x32xf32>
    %491 = math.tanh %490 : vector<2x32xf32>
    %492 = arith.mulf %487, %491 : vector<2x32xf32>
    %c1_283 = arith.constant 1 : index
    %c10_284 = arith.constant 10 : index
    %c0_285 = arith.constant 0 : index
    %493 = vector.load %arg13[%c1_283, %c10_284, %c0_285] : memref<2x16x128xf32, #tpu.memory_space<vmem>>, vector<1x2x128xf32>
    %494 = vector.shape_cast %493 : vector<1x2x128xf32> to vector<2x128xf32>
    %cst_286 = arith.constant dense<0.000000e+00> : vector<2x128xf32>
    %495 = tpu.matmul %492, %358, %cst_286 {dimension_numbers = #tpu.dot_dimension_numbers<[1], [0], [0], [1], [0, 0, 1, 1], [], []>} : vector<2x32xf32>, vector<32x128xf32>, vector<2x128xf32> -> vector<2x128xf32>
    %496 = arith.addf %494, %495 : vector<2x128xf32>
    %497 = math.tanh %496 : vector<2x128xf32>
    %498 = vector.extract_strided_slice %497 {offsets = [0, 0], sizes = [2, 32], strides = [1, 1]} : vector<2x128xf32> to vector<2x32xf32>
    %cst_287 = arith.constant 5.000000e-01 : f32
    %499 = vector.broadcast %cst_287 : f32 to vector<2x32xf32>
    %500 = arith.mulf %499, %498 : vector<2x32xf32>
    %cst_288 = arith.constant 5.000000e-01 : f32
    %501 = vector.broadcast %cst_288 : f32 to vector<2x32xf32>
    %502 = arith.addf %500, %501 : vector<2x32xf32>
    %503 = vector.extract_strided_slice %497 {offsets = [0, 32], sizes = [2, 32], strides = [1, 1]} : vector<2x128xf32> to vector<2x32xf32>
    %cst_289 = arith.constant 5.000000e-01 : f32
    %504 = vector.broadcast %cst_289 : f32 to vector<2x32xf32>
    %505 = arith.mulf %504, %503 : vector<2x32xf32>
    %cst_290 = arith.constant 5.000000e-01 : f32
    %506 = vector.broadcast %cst_290 : f32 to vector<2x32xf32>
    %507 = arith.addf %505, %506 : vector<2x32xf32>
    %508 = vector.extract_strided_slice %497 {offsets = [0, 64], sizes = [2, 32], strides = [1, 1]} : vector<2x128xf32> to vector<2x32xf32>
    %509 = vector.extract_strided_slice %497 {offsets = [0, 96], sizes = [2, 32], strides = [1, 1]} : vector<2x128xf32> to vector<2x32xf32>
    %cst_291 = arith.constant 5.000000e-01 : f32
    %510 = vector.broadcast %cst_291 : f32 to vector<2x32xf32>
    %511 = arith.mulf %510, %509 : vector<2x32xf32>
    %cst_292 = arith.constant 5.000000e-01 : f32
    %512 = vector.broadcast %cst_292 : f32 to vector<2x32xf32>
    %513 = arith.addf %511, %512 : vector<2x32xf32>
    %514 = arith.mulf %507, %490 : vector<2x32xf32>
    %515 = arith.mulf %502, %508 : vector<2x32xf32>
    %516 = arith.addf %514, %515 : vector<2x32xf32>
    %517 = math.tanh %516 : vector<2x32xf32>
    %518 = arith.mulf %513, %517 : vector<2x32xf32>
    %c1_293 = arith.constant 1 : index
    %c12_294 = arith.constant 12 : index
    %c0_295 = arith.constant 0 : index
    %519 = vector.load %arg13[%c1_293, %c12_294, %c0_295] : memref<2x16x128xf32, #tpu.memory_space<vmem>>, vector<1x2x128xf32>
    %520 = vector.shape_cast %519 : vector<1x2x128xf32> to vector<2x128xf32>
    %cst_296 = arith.constant dense<0.000000e+00> : vector<2x128xf32>
    %521 = tpu.matmul %518, %358, %cst_296 {dimension_numbers = #tpu.dot_dimension_numbers<[1], [0], [0], [1], [0, 0, 1, 1], [], []>} : vector<2x32xf32>, vector<32x128xf32>, vector<2x128xf32> -> vector<2x128xf32>
    %522 = arith.addf %520, %521 : vector<2x128xf32>
    %523 = math.tanh %522 : vector<2x128xf32>
    %524 = vector.extract_strided_slice %523 {offsets = [0, 0], sizes = [2, 32], strides = [1, 1]} : vector<2x128xf32> to vector<2x32xf32>
    %cst_297 = arith.constant 5.000000e-01 : f32
    %525 = vector.broadcast %cst_297 : f32 to vector<2x32xf32>
    %526 = arith.mulf %525, %524 : vector<2x32xf32>
    %cst_298 = arith.constant 5.000000e-01 : f32
    %527 = vector.broadcast %cst_298 : f32 to vector<2x32xf32>
    %528 = arith.addf %526, %527 : vector<2x32xf32>
    %529 = vector.extract_strided_slice %523 {offsets = [0, 32], sizes = [2, 32], strides = [1, 1]} : vector<2x128xf32> to vector<2x32xf32>
    %cst_299 = arith.constant 5.000000e-01 : f32
    %530 = vector.broadcast %cst_299 : f32 to vector<2x32xf32>
    %531 = arith.mulf %530, %529 : vector<2x32xf32>
    %cst_300 = arith.constant 5.000000e-01 : f32
    %532 = vector.broadcast %cst_300 : f32 to vector<2x32xf32>
    %533 = arith.addf %531, %532 : vector<2x32xf32>
    %534 = vector.extract_strided_slice %523 {offsets = [0, 64], sizes = [2, 32], strides = [1, 1]} : vector<2x128xf32> to vector<2x32xf32>
    %535 = vector.extract_strided_slice %523 {offsets = [0, 96], sizes = [2, 32], strides = [1, 1]} : vector<2x128xf32> to vector<2x32xf32>
    %cst_301 = arith.constant 5.000000e-01 : f32
    %536 = vector.broadcast %cst_301 : f32 to vector<2x32xf32>
    %537 = arith.mulf %536, %535 : vector<2x32xf32>
    %cst_302 = arith.constant 5.000000e-01 : f32
    %538 = vector.broadcast %cst_302 : f32 to vector<2x32xf32>
    %539 = arith.addf %537, %538 : vector<2x32xf32>
    %540 = arith.mulf %533, %516 : vector<2x32xf32>
    %541 = arith.mulf %528, %534 : vector<2x32xf32>
    %542 = arith.addf %540, %541 : vector<2x32xf32>
    %543 = math.tanh %542 : vector<2x32xf32>
    %544 = arith.mulf %539, %543 : vector<2x32xf32>
    %c1_303 = arith.constant 1 : index
    %c14_304 = arith.constant 14 : index
    %c0_305 = arith.constant 0 : index
    %545 = vector.load %arg13[%c1_303, %c14_304, %c0_305] : memref<2x16x128xf32, #tpu.memory_space<vmem>>, vector<1x2x128xf32>
    %546 = vector.shape_cast %545 : vector<1x2x128xf32> to vector<2x128xf32>
    %cst_306 = arith.constant dense<0.000000e+00> : vector<2x128xf32>
    %547 = tpu.matmul %544, %358, %cst_306 {dimension_numbers = #tpu.dot_dimension_numbers<[1], [0], [0], [1], [0, 0, 1, 1], [], []>} : vector<2x32xf32>, vector<32x128xf32>, vector<2x128xf32> -> vector<2x128xf32>
    %548 = arith.addf %546, %547 : vector<2x128xf32>
    %549 = math.tanh %548 : vector<2x128xf32>
    %550 = vector.extract_strided_slice %549 {offsets = [0, 0], sizes = [2, 32], strides = [1, 1]} : vector<2x128xf32> to vector<2x32xf32>
    %cst_307 = arith.constant 5.000000e-01 : f32
    %551 = vector.broadcast %cst_307 : f32 to vector<2x32xf32>
    %552 = arith.mulf %551, %550 : vector<2x32xf32>
    %cst_308 = arith.constant 5.000000e-01 : f32
    %553 = vector.broadcast %cst_308 : f32 to vector<2x32xf32>
    %554 = arith.addf %552, %553 : vector<2x32xf32>
    %555 = vector.extract_strided_slice %549 {offsets = [0, 32], sizes = [2, 32], strides = [1, 1]} : vector<2x128xf32> to vector<2x32xf32>
    %cst_309 = arith.constant 5.000000e-01 : f32
    %556 = vector.broadcast %cst_309 : f32 to vector<2x32xf32>
    %557 = arith.mulf %556, %555 : vector<2x32xf32>
    %cst_310 = arith.constant 5.000000e-01 : f32
    %558 = vector.broadcast %cst_310 : f32 to vector<2x32xf32>
    %559 = arith.addf %557, %558 : vector<2x32xf32>
    %560 = vector.extract_strided_slice %549 {offsets = [0, 64], sizes = [2, 32], strides = [1, 1]} : vector<2x128xf32> to vector<2x32xf32>
    %561 = vector.extract_strided_slice %549 {offsets = [0, 96], sizes = [2, 32], strides = [1, 1]} : vector<2x128xf32> to vector<2x32xf32>
    %cst_311 = arith.constant 5.000000e-01 : f32
    %562 = vector.broadcast %cst_311 : f32 to vector<2x32xf32>
    %563 = arith.mulf %562, %561 : vector<2x32xf32>
    %cst_312 = arith.constant 5.000000e-01 : f32
    %564 = vector.broadcast %cst_312 : f32 to vector<2x32xf32>
    %565 = arith.addf %563, %564 : vector<2x32xf32>
    %566 = arith.mulf %559, %542 : vector<2x32xf32>
    %567 = arith.mulf %554, %560 : vector<2x32xf32>
    %568 = arith.addf %566, %567 : vector<2x32xf32>
    %569 = math.tanh %568 : vector<2x32xf32>
    %570 = arith.mulf %565, %569 : vector<2x32xf32>
    %c1_313 = arith.constant 1 : index
    %c0_314 = arith.constant 0 : index
    %c0_315 = arith.constant 0 : index
    %571 = vector.load %arg10[%c1_313, %c0_314, %c0_315] : memref<2x2x32xf32, #tpu.memory_space<vmem>>, vector<1x2x32xf32>
    %572 = vector.shape_cast %571 : vector<1x2x32xf32> to vector<2x32xf32>
    %573 = vector.shape_cast %570 : vector<2x32xf32> to vector<1x2x32xf32>
    tpu.vector_store %arg10[%c1_313, %c0_314, %c0_315], %573 {strides = array<i32>} : memref<2x2x32xf32, #tpu.memory_space<vmem>>, vector<1x2x32xf32>,
    %c1_316 = arith.constant 1 : index
    %c0_317 = arith.constant 0 : index
    %c0_318 = arith.constant 0 : index
    %574 = vector.load %arg11[%c1_316, %c0_317, %c0_318] : memref<2x2x32xf32, #tpu.memory_space<vmem>>, vector<1x2x32xf32>
    %575 = vector.shape_cast %574 : vector<1x2x32xf32> to vector<2x32xf32>
    %576 = vector.shape_cast %568 : vector<2x32xf32> to vector<1x2x32xf32>
    tpu.vector_store %arg11[%c1_316, %c0_317, %c0_318], %576 {strides = array<i32>} : memref<2x2x32xf32, #tpu.memory_space<vmem>>, vector<1x2x32xf32>,
    %c0_319 = arith.constant 0 : index
    %c0_320 = arith.constant 0 : index
    %577 = vector.load %arg7[%c0_319, %c0_320] : memref<1x32xf32, #tpu.memory_space<vmem>>, vector<1x32xf32>
    %578 = vector.broadcast %577 : vector<1x32xf32> to vector<2x32xf32>
    %579 = arith.mulf %570, %578 : vector<2x32xf32>
    %cst_321 = arith.constant dense<0.000000e+00> : vector<2xf32>
    %580 = vector.multi_reduction <add>, %579, %cst_321 [1] : vector<2x32xf32> to vector<2xf32>
    %581 = vector.shape_cast %580 : vector<2xf32> to vector<2x1xf32>
    %c0_322 = arith.constant 0 : index
    %c0_323 = arith.constant 0 : index
    %582 = vector.load %arg8[%c0_322, %c0_323] : memref<1x1xf32, #tpu.memory_space<vmem>>, vector<1x1xf32>
    %583 = vector.broadcast %582 : vector<1x1xf32> to vector<2x1xf32>
    %584 = arith.addf %581, %583 : vector<2x1xf32>
    %585 = arith.negf %584 : vector<2x1xf32>
    %586 = math.exp %585 : vector<2x1xf32>
    %cst_324 = arith.constant 1.000000e+00 : f32
    %587 = vector.broadcast %cst_324 : f32 to vector<2x1xf32>
    %588 = arith.addf %587, %586 : vector<2x1xf32>
    %589 = arith.divf %587, %588 : vector<2x1xf32>
    %c0_325 = arith.constant 0 : index
    %c0_326 = arith.constant 0 : index
    %590 = vector.load %arg9[%c0_325, %c0_326] : memref<2x1xf32, #tpu.memory_space<vmem>>, vector<2x1xf32>
    tpu.vector_store %arg9[%c0_325, %c0_326], %589 {strides = array<i32>} : memref<2x1xf32, #tpu.memory_space<vmem>>, vector<2x1xf32>,
    return
  }
}

</mosaic_0001>

<bundles_post_ra>
// kernel: sentiment_rnn_forward.1
= control target key start
LH: loop header
LB: loop body
LE: loop exit
PB: predicated region body
PF: predicated region fallthrough
CT: control target
= control target key end

     0   :  { %s1935_s0 = inlined_call_operand.vmem [shape: s32[2,8], index: 0, kind: input, shape index: {}]   ;;  %s1936_s1 = inlined_call_operand.vmem [shape: f32[50,1,32], index: 1, kind: input, shape index: {}]   ;;  %s1937_s2 = inlined_call_operand.vmem [shape: f32[2,32,128], index: 2, kind: input, shape index: {}]   ;;  %s1938_s3 = inlined_call_operand.hbm [shape: f32[2,32,128], index: 3, kind: input, shape index: {}]   ;;  %s1939_s4 = inlined_call_operand.vmem [shape: f32[2,1,128], index: 4, kind: input, shape index: {}]   ;;  %s1940_s5 = inlined_call_operand.vmem [shape: f32[2,2,32], index: 5, kind: input, shape index: {}]   ;;  %s1941_s6 = inlined_call_operand.vmem [shape: f32[2,2,32], index: 6, kind: input, shape index: {}]   ;;  %s1942_s7 = inlined_call_operand.vmem [shape: f32[1,32], index: 7, kind: input, shape index: {}]   ;;  %s1943_s8 = inlined_call_operand.<no memory space> [shape: f32[1,1], index: 8, kind: input, shape index: {}]   ;;  %s1944_s9 = inlined_call_operand.vmem [shape: f32[2,1], index: 9, kind: output, shape index: {0}]   ;;  %s1945_s10 = inlined_call_operand.hbm [shape: f32[2,2,32], index: 10, kind: output, shape index: {1}]   ;;  %s1946_s11 = inlined_call_operand.hbm [shape: f32[2,2,32], index: 11, kind: output, shape index: {2}]  }
   0x1   :  { %v17_v0 = vstv %s1943_s8 }
   0x2   :  { %18 = vst [vmem:[#allocation4] sm:$0x1] %v17_v0 }
   0x3   :  { %19 = vsyncpa [#allocation8], 0 }
   0x4   :  { %20 = vsyncpa [#allocation6], 0 }
   0x5   :  { %21 = vsyncpa [#allocation7], 0 }
   0x6   :  { %22 = vsyncpa [#allocation12], 0  ;;  %s28_s21 = sshll.u32 %s1935_s0, 4  ;;  %s40_s24 = sshll.u32 %s1938_s3, 4  ;;  %s29_s21 = int_to_ptr.vmem [resolvable:$true] %s28_s21  ;;  %s41_s24 = int_to_ptr.hbm [resolvable:$true] %s40_s24 }
   0x7   :  { %s1471_s25 = smov [#allocation5]   ;;  %s1472_s26 = smov [#allocation9]  }
   0x8   :  { %31 = dma.vmem_to_smem %s29_s21, 32, %s1471_s25, [#allocation8]  }
   0x9   :  { %s42_s27 = sshll.u32 %s1472_s26, 4  ;;  %s1473_s8 = smov 128   ;;  %s43_s27 = int_to_ptr.vmem [resolvable:$true] %s42_s27 }
   0xa   :  { %s1474_s28 = smov 8  }
   0xb   :  { %48 = dma.hbm_to_vmem [thread:$0]  %s41_s24, 1024, %s43_s27, [#allocation6], %s1473_s8, %s1473_s8, %s1474_s28  }
   0xc   :  { %1463 = dma.done.wait [#allocation8], 32  }
   0xd   :  { %1464 = vsyncadd [#allocation8], 4294967264 }
   0xe   :  { %1465 = dma.done.wait [#allocation6], 1024  }
   0xf   :  { %1466 = vsyncadd [#allocation6], 4294966272 }
  0x10   :  { %67 = sfence }
  0x11   :  { %v138_v1 = vld [vmem:[%s1937_s2 + $0x18] sm:$0xff]  ;;  %v137_v2 = vld [vmem:[%s1937_s2 + $0x10] sm:$0xff]  ;;  %s68_s12 = sld [smem:[#allocation5]]  ;;  %v1558_v4 = vld [vmem:[#allocation9 + $0x10] sm:$0xff]  ;;  %vm71_vm0 = vcmask 253952   ;;  %vm143_vm1 = vcmask 261120  }
  0x12   :  { %162 = vmatpush.msra.mxu0 %v138_v1  ;;  %s1248_s13 = sld [smem:[#allocation5 + $0x80]]  ;;  %v1556_v3 = vld [vmem:[#allocation9 + $0x18] sm:$0xff]  ;;  %v135_v6 = vld [vmem:[%s1937_s2] sm:$0xff]  ;;  %v1580_v8 = vld [vmem:[#allocation9] sm:$0xff]  ;;  %s1476_s3 = smov 32   ;;  %vm744_vm2 = vcmask 254976  }
  0x13   :  { %v136_v5 = vld [vmem:[%s1937_s2 + $0x8] sm:$0xff]  ;;  %s1563_s16 = sld [smem:[#allocation5 + $0x1]]  ;;  %207 = vmatpush.msra.mxu1 %v1556_v3  ;;  %280 = vmatpush.msra.mxu3 %v1556_v3  ;;  %v1572_v7 = vld [vmem:[#allocation9 + $0x8] sm:$0xff]  ;;  %v1659_v37 = vld [vmem:[%s1937_s2 + $0x30] sm:$0xff]  ;;  %s1479_s17 = smov [#allocation11]   ;;  %vm1188_vm5 = vcmask 1024  }
  0x14   :  { %163 = vmatpush.msra.mxu0 %v137_v2  ;;  %s1570_s19 = sld [smem:[#allocation5 + $0x81]]  ;;  %v189_v9 = vld [vmem:[%s1940_s5] sm:$0x3]  ;;  %v1654_v36 = vld [vmem:[%s1937_s2 + $0x38] sm:$0xff]  ;;  %v1666_v38 = vld [vmem:[%s1937_s2 + $0x28] sm:$0xff] }
  0x15   :  { %s1574_s20 = sld [smem:[#allocation5 + $0x2]]  ;;  %208 = vmatpush.msra.mxu1 %v1558_v4  ;;  %281 = vmatpush.msra.mxu3 %v1558_v4  ;;  %v1641_v19 = vld [vmem:[%s1939_s4] ss:$0 sm:$0xff]  ;;  %v1705_v43 = vld [vmem:[%s1939_s4 + $0x1] ss:$0 sm:$0xff] }
  0x16   :  { %164 = vmatpush.msra.mxu0 %v136_v5  ;;  %s1578_s21 = sld [smem:[#allocation5 + $0x82]]  ;;  %v190_v26 = vld [vmem:[%s1941_s6] sm:$0x3]  ;;  %257 = vmatpush.msra.mxu2 %v1654_v36 }
  0x17   :  { %s69_s24 = scalar_lea.vmem %s1936_s1, %s68_s12  ;;  %s1585_s25 = sld [smem:[#allocation5 + $0x3]]  ;;  %209 = vmatpush.msra.mxu1 %v1572_v7  ;;  %282 = vmatpush.msra.mxu3 %v1572_v7  ;;  %v1674_v39 = vld [vmem:[%s1937_s2 + $0x20] sm:$0xff] }
  0x18   :  { %165 = vmatpush.msra.mxu0 %v135_v6  ;;  %v70_v10 = vld [vmem:[%s69_s24] sm:$0x1]  ;;  %s74_s0 = scalar_lea.vmem %s1936_s1, %s1248_s13  ;;  %s1254_s29 = sld [smem:[#allocation5 + $0x83]]  ;;  %258 = vmatpush.msra.mxu2 %v1659_v37 }
  0x19   :  { %72 = vst.msk [vmem:[#allocation2] sm:$0x1] %vm71_vm0, %v70_v10  ;;  %v75_v11 = vld [vmem:[%s74_s0] sm:$0x1]  ;;  %s78_s12 = scalar_lea.vmem %s1936_s1, %s1563_s16  ;;  %210 = vmatpush.msra.mxu1 %v1580_v8  ;;  %283 = vmatpush.msra.mxu3 %v1580_v8  ;;  %s1947_s0 = smov 64  }
  0x1a   :  { %76 = vst.msk [vmem:[#allocation2 + $0x1] sm:$0x1] %vm71_vm0, %v75_v11  ;;  %v79_v12 = vld [vmem:[%s78_s12] sm:$0x1]  ;;  %s82_s15 = scalar_lea.vmem %s1936_s1, %s1570_s19  ;;  %1270 = vmatmul.msk.f32.vlgmr.msra.gmra.mxu1 %vm143_vm1, %v189_v9  ;;  %416 = vmatpush.msrb.mxu0 %v1556_v3  ;;  %s1255_s4 = sld [smem:[#allocation5 + $0x4]] }
  0x1b   :  { %80 = vst.msk [vmem:[#allocation2 + $0x2] sm:$0x1] %vm71_vm0, %v79_v12  ;;  %v83_v13 = vld [vmem:[%s82_s15] sm:$0x1]  ;;  %s86_s18 = scalar_lea.vmem %s1936_s1, %s1574_s20  ;;  %326 = vmatpush.msrb.mxu1 %v1654_v36  ;;  %394 = vmatpush.msrb.mxu3 %v1654_v36  ;;  %s1257_s19 = sld [smem:[#allocation5 + $0x5]] }
  0x1c   :  { %84 = vst.msk [vmem:[#allocation2 + $0x3] sm:$0x1] %vm71_vm0, %v83_v13  ;;  %v87_v14 = vld [vmem:[%s86_s18] sm:$0x1]  ;;  %s90_s24 = scalar_lea.vmem %s1936_s1, %s1578_s21  ;;  %417 = vmatpush.msrb.mxu0 %v1558_v4  ;;  %259 = vmatpush.msra.mxu2 %v1666_v38  ;;  %s1258_s26 = sld [smem:[#allocation5 + $0x85]] }
  0x1d   :  { %88 = vst.msk [vmem:[#allocation2 + $0x4] sm:$0x1] %vm71_vm0, %v87_v14  ;;  %v91_v15 = vld [vmem:[%s90_s24] sm:$0x1]  ;;  %s94_s27 = scalar_lea.vmem %s1936_s1, %s1585_s25  ;;  %327 = vmatpush.msrb.mxu1 %v1659_v37  ;;  %395 = vmatpush.msrb.mxu3 %v1659_v37  ;;  %s1256_s24 = sld [smem:[#allocation5 + $0x84]] }
  0x1e   :  { %92 = vst.msk [vmem:[#allocation2 + $0x5] sm:$0x1] %vm71_vm0, %v91_v15  ;;  %v95_v16 = vld [vmem:[%s94_s27] sm:$0x1]  ;;  %s98_s28 = scalar_lea.vmem %s1936_s1, %s1254_s29  ;;  %418 = vmatpush.msrb.mxu0 %v1572_v7  ;;  %260 = vmatpush.msra.mxu2 %v1674_v39  ;;  %s1259_s27 = sld [smem:[#allocation5 + $0x6]] }
  0x1f   :  { %96 = vst.msk [vmem:[#allocation2 + $0x6] sm:$0x1] %vm71_vm0, %v95_v16  ;;  %v99_v17 = vld [vmem:[%s98_s28] sm:$0x1]  ;;  %328 = vmatpush.msrb.mxu1 %v1666_v38  ;;  %396 = vmatpush.msrb.mxu3 %v1666_v38  ;;  %s1260_s20 = sld [smem:[#allocation5 + $0x86]]  ;;  %s1209_s18 = sshll.u32 %s1479_s17, 4  ;;  %s1210_s18 = int_to_ptr.vmem [resolvable:$true] %s1209_s18 }
  0x20   :  { %100 = vst.msk [vmem:[#allocation2 + $0x7] sm:$0x1] %vm71_vm0, %v99_v17  ;;  %419 = vmatpush.msrb.mxu0 %v1580_v8  ;;  %348 = vmatpush.msrb.mxu2 %v1556_v3  ;;  %s1261_s8 = sld [smem:[#allocation5 + $0x7]]  ;;  %s102_s29 = scalar_lea.vmem %s1936_s1, %s1255_s4 }
  0x21   :  { %329 = vmatpush.msrb.mxu1 %v1674_v39  ;;  %397 = vmatpush.msrb.mxu3 %v1674_v39  ;;  %s1262_s28 = sld [smem:[#allocation5 + $0x87]]  ;;  %s110_s16 = scalar_lea.vmem %s1936_s1, %s1257_s19  ;;  %v103_v15 = vld [vmem:[%s102_s29] sm:$0x1] }
  0x22   :  { %349 = vmatpush.msrb.mxu2 %v1558_v4  ;;  %s114_s22 = scalar_lea.vmem %s1936_s1, %s1258_s26  ;;  %v111_v17 = vld [vmem:[%s110_s16] sm:$0x1]  ;;  %104 = vst.msk [vmem:[#allocation2 + $0x8] sm:$0x1] %vm71_vm0, %v103_v15  ;;  %s1477_s29 = smov 96  }
  0x23   :  { %462 = vmatpush.msra.mxu1 %v1654_v36  ;;  %s106_s14 = scalar_lea.vmem %s1936_s1, %s1256_s24  ;;  %112 = vst.msk [vmem:[#allocation2 + $0xa] sm:$0x1] %vm71_vm0, %v111_v17  ;;  %v1803_v17 = vld [vmem:[#allocation9 + $0x30] sm:$0xff]  ;;  %s1198_s16 = sshll.u32 %s1945_s10, 4  ;;  %s1199_s16 = int_to_ptr.hbm [resolvable:$true] %s1198_s16 }
  0x24   :  { %350 = vmatpush.msrb.mxu2 %v1572_v7  ;;  %v107_v16 = vld [vmem:[%s106_s14] sm:$0x1]  ;;  %s1211_s4 = sshll.u32 %s1946_s11, 4  ;;  %s1212_s4 = int_to_ptr.hbm [resolvable:$true] %s1211_s4 }
  0x25   :  { %463 = vmatpush.msra.mxu1 %v1659_v37  ;;  %s122_s25 = scalar_lea.vmem %s1936_s1, %s1260_s20  ;;  %108 = vst.msk [vmem:[#allocation2 + $0x9] sm:$0x1] %vm71_vm0, %v107_v16  ;;  %v1801_v16 = vld [vmem:[#allocation9 + $0x38] sm:$0xff] }
  0x26   :  { %351 = vmatpush.msrb.mxu2 %v1580_v8  ;;  %s126_s30 = scalar_lea.vmem %s1936_s1, %s1261_s8 }
  0x27   :  { %v133_v18 = vld [vmem:[#allocation2] sm:$0xff]  ;;  %464 = vmatpush.msra.mxu1 %v1666_v38 }
  0x28   :  { %1263 = vmatmul.msk.f32.vlgmr.msra.gmra.mxu0 %vm143_vm1, %v133_v18  ;;  %v115_v18 = vld [vmem:[%s114_s22] sm:$0x1]  ;;  %s1480_s22 = smov 2  }
  0x29   :  { %552 = vmatpush.msra.mxu0 %v1556_v3  ;;  %465 = vmatpush.msra.mxu1 %v1674_v39  ;;  %116 = vst.msk [vmem:[#allocation2 + $0xb] sm:$0x1] %vm71_vm0, %v115_v18  ;;  %v1807_v18 = vld [vmem:[#allocation9 + $0x28] sm:$0xff] }
  0x2b   :  { %553 = vmatpush.msra.mxu0 %v1558_v4 }
  0x2d   :  { %554 = vmatpush.msra.mxu0 %v1572_v7 }
  0x2f   :  { %555 = vmatpush.msra.mxu0 %v1580_v8 }
  0x97   :  { %v212_v22 = vpop.f32.mrf.mxu1 }
  0xa5   :  { %v167_v20 = vpop.f32.mrf.mxu0 }
  0xa6   :  { %v168_v21 = vadd.f32 %v1641_v19, %v167_v20 }
  0xa8   :  { %173 = vst [vmem:[#allocation3] sm:$0xff] %v168_v21  ;;  %v123_v21 = vld [vmem:[%s122_s25] sm:$0x1] }
  0xa9   :  { %124 = vst.msk [vmem:[#allocation2 + $0xd] sm:$0x1] %vm71_vm0, %v123_v21 }
  0xaf   :  { %v191_v23 = vld [vmem:[#allocation3] sm:$0x3]  ;;  %v267_v45 = vld [vmem:[#allocation3 + $0x2] sm:$0x3]  ;;  %v335_v63 = vld [vmem:[#allocation3 + $0x4] sm:$0x3] }
  0xb0   :  { %v215_v24 = vadd.f32 %v212_v22, %v191_v23  ;;  %v127_v22 = vld [vmem:[%s126_s30] sm:$0x1] }
  0xb1   :  { %128 = vst.msk [vmem:[#allocation2 + $0xe] sm:$0x1] %vm71_vm0, %v127_v22  ;;  %v1286_v22 = vld [vmem:[%s1940_s5 + $0x2] sm:$0x3] }
  0xb2   :  { %1311 = vtanh.f32 %v215_v24 }
  0xb8   :  { %v1312_v25 = vpop.eup %1311 }
  0xb9   :  { %225 = vrot.lane.b32.xlu0 %v1312_v25, %s1947_s0  ;;  %v217_v27 = vmul.f32 0.5, %v1312_v25 }
  0xbb   :  { %v218_v28 = vadd.f32 0.5, %v217_v27 }
  0xc1   :  { %220 = vrot.lane.b32.xlu0 %v190_v26, %s1476_s3 }
 0x12b   :  { %v226_v29 = vpop.permute.xlu0 %225 }
 0x12c   :  { %v228_v30 = vmul.f32 %v226_v29, %v218_v28 }
 0x12e   :  { %230 = vrot.lane.b32.xlu1 %v228_v30, %s1476_s3 }
 0x133   :  { %v221_v31 = vpop.permute.xlu0 %220 }
 0x134   :  { %v223_v32 = vmul.f32 %v221_v31, %v218_v28 }
 0x1a0   :  { %v231_v33 = vpop.permute.xlu1 %230 }
 0x1a1   :  { %v233_v34 = vadd.f32 %v231_v33, %v223_v32 }
 0x1a3   :  { %1313 = vtanh.f32 %v233_v34 }
 0x1a9   :  { %v1314_v35 = vpop.eup %1313 }
 0x1aa   :  { %236 = vrot.lane.b32.xlu1 %v1314_v35, %s1947_s0 }
 0x21c   :  { %v237_v40 = vpop.permute.xlu1 %236 }
 0x21d   :  { %v239_v41 = vmul.f32 %v237_v40, %v218_v28 }
 0x21f   :  { %241 = vrot.lane.b32.xlu2 %v239_v41, %s1476_s3 }
 0x279   :  { %v242_v42 = vpop.permute.xlu2 %241 }
 0x27a   :  { %1271 = vmatmul.msk.f32.vlgmr.msra.gmra.mxu2 %vm143_vm1, %v242_v42  ;;  %1272 = vmatmul.msk.f32.vlgmr.msra.gmra.mxu3 %vm143_vm1, %v242_v42 }
 0x27b   :  { %484 = vmatpush.msra.mxu2 %v1556_v3  ;;  %530 = vmatpush.msra.mxu3 %v1654_v36 }
 0x27d   :  { %485 = vmatpush.msra.mxu2 %v1558_v4  ;;  %531 = vmatpush.msra.mxu3 %v1659_v37 }
 0x27f   :  { %486 = vmatpush.msra.mxu2 %v1572_v7  ;;  %532 = vmatpush.msra.mxu3 %v1666_v38 }
 0x281   :  { %487 = vmatpush.msra.mxu2 %v1580_v8  ;;  %533 = vmatpush.msra.mxu3 %v1674_v39 }
 0x2fd   :  { %v262_v44 = vpop.f32.mrf.mxu2  ;;  %v285_v46 = vpop.f32.mrf.mxu3 }
 0x2fe   :  { %v263_v47 = vadd.f32 %v1705_v43, %v262_v44  ;;  %v288_v48 = vadd.f32 %v285_v46, %v267_v45 }
 0x300   :  { %266 = vst [vmem:[#allocation3 + $0x10] sm:$0x3] %v263_v47  ;;  %1315 = vtanh.f32 %v288_v48 }
 0x306   :  { %v1316_v49 = vpop.eup %1315 }
 0x307   :  { %294 = vrot.lane.b32.xlu2 %v1316_v49, %s1947_s0  ;;  %v290_v50 = vmul.f32 0.5, %v1316_v49 }
 0x309   :  { %v291_v51 = vadd.f32 0.5, %v290_v50 }
 0x30b   :  { %v292_v54 = vmul.f32 %v291_v51, %v233_v34 }
 0x361   :  { %v295_v52 = vpop.permute.xlu2 %294 }
 0x362   :  { %v297_v53 = vmul.f32 %v295_v52, %v291_v51 }
 0x364   :  { %299 = vrot.lane.b32.xlu0 %v297_v53, %s1476_s3 }
 0x3d6   :  { %v300_v55 = vpop.permute.xlu0 %299 }
 0x3d7   :  { %v302_v56 = vadd.f32 %v300_v55, %v292_v54 }
 0x3d9   :  { %1317 = vtanh.f32 %v302_v56 }
 0x3df   :  { %v1318_v57 = vpop.eup %1317 }
 0x3e0   :  { %305 = vrot.lane.b32.xlu1 %v1318_v57, %s1947_s0 }
 0x452   :  { %v306_v58 = vpop.permute.xlu1 %305 }
 0x453   :  { %v308_v59 = vmul.f32 %v306_v58, %v291_v51 }
 0x455   :  { %310 = vrot.lane.b32.xlu2 %v308_v59, %s1476_s3 }
 0x4af   :  { %v311_v60 = vpop.permute.xlu2 %310 }
 0x4b0   :  { %1273 = vmatmul.msk.f32.vlgmr.msrb.gmra.mxu1 %vm143_vm1, %v311_v60  ;;  %1274 = vmatmul.msk.f32.vlgmr.msrb.gmra.mxu2 %vm143_vm1, %v311_v60 }
 0x4b1   :  { %620 = vmatpush.msrb.mxu2 %v1556_v3  ;;  %598 = vmatpush.msrb.mxu1 %v1654_v36 }
 0x4b3   :  { %621 = vmatpush.msrb.mxu2 %v1558_v4  ;;  %599 = vmatpush.msrb.mxu1 %v1659_v37 }
 0x4b5   :  { %622 = vmatpush.msrb.mxu2 %v1572_v7  ;;  %600 = vmatpush.msrb.mxu1 %v1666_v38 }
 0x4b7   :  { %623 = vmatpush.msrb.mxu2 %v1580_v8  ;;  %601 = vmatpush.msrb.mxu1 %v1674_v39 }
 0x52d   :  { %v331_v61 = vpop.f32.mrf.mxu1 }
 0x52e   :  { %v332_v62 = vadd.f32 %v1705_v43, %v331_v61 }
 0x530   :  { %334 = vst [vmem:[#allocation3 + $0x12] sm:$0x3] %v332_v62 }
 0x533   :  { %v353_v0 = vpop.f32.mrf.mxu2 }
 0x534   :  { %v356_v1 = vadd.f32 %v353_v0, %v335_v63 }
 0x536   :  { %1319 = vtanh.f32 %v356_v1 }
 0x53c   :  { %v1320_v2 = vpop.eup %1319 }
 0x53d   :  { %362 = vrot.lane.b32.xlu0 %v1320_v2, %s1947_s0  ;;  %v358_v5 = vmul.f32 0.5, %v1320_v2 }
 0x53f   :  { %v359_v6 = vadd.f32 0.5, %v358_v5 }
 0x541   :  { %v360_v11 = vmul.f32 %v359_v6, %v302_v56 }
 0x5af   :  { %v363_v9 = vpop.permute.xlu0 %362 }
 0x5b0   :  { %v365_v10 = vmul.f32 %v363_v9, %v359_v6 }
 0x5b2   :  { %367 = vrot.lane.b32.xlu1 %v365_v10, %s1476_s3 }
 0x624   :  { %v368_v12 = vpop.permute.xlu1 %367 }
 0x625   :  { %v1725_v13 = vadd.f32 %v368_v12, %v360_v11 }
 0x627   :  { %1321 = vtanh.f32 %v1725_v13 }
 0x62d   :  { %v1322_v14 = vpop.eup %1321 }
 0x62e   :  { %373 = vrot.lane.b32.xlu2 %v1322_v14, %s1947_s0  ;;  %s118_s0 = scalar_lea.vmem %s1936_s1, %s1259_s27  ;;  %s130_s27 = scalar_lea.vmem %s1936_s1, %s1262_s28 }
 0x62f   :  { %v119_v20 = vld [vmem:[%s118_s0] sm:$0x1]  ;;  %s1949_s1 = smov 64  }
 0x630   :  { %120 = vst.msk [vmem:[#allocation2 + $0xc] sm:$0x1] %vm71_vm0, %v119_v20  ;;  %v131_v23 = vld [vmem:[%s130_s27] sm:$0x1]  ;;  %v1812_v20 = vld [vmem:[#allocation9 + $0x20] sm:$0xff] }
 0x631   :  { %132 = vst.msk [vmem:[#allocation2 + $0xf] sm:$0x1] %vm71_vm0, %v131_v23 }
 0x638   :  { %v134_v24 = vld [vmem:[#allocation2 + $0x8] sm:$0xff] }
 0x639   :  { %1264 = vmatmul.msk.f32.gmra.mxu0 %vm143_vm1, %v134_v24 }
 0x688   :  { %v374_v25 = vpop.permute.xlu2 %373 }
 0x689   :  { %v376_v26 = vmul.f32 %v374_v25, %v359_v6 }
 0x68b   :  { %378 = vrot.lane.b32.xlu0 %v376_v26, %s1476_s3 }
 0x6b6   :  { %v170_v27 = vpop.f32.mrf.mxu0 }
 0x6b7   :  { %v171_v28 = vadd.f32 %v1641_v19, %v170_v27  ;;  %v403_v19 = vld [vmem:[#allocation3 + $0x6] sm:$0x3] }
 0x6b9   :  { %174 = vst [vmem:[#allocation3 + $0x8] sm:$0xff] %v171_v28  ;;  %v760_v28 = vld [vmem:[#allocation3 + $0x10] sm:$0x3] }
 0x6c0   :  { %v471_v49 = vld [vmem:[#allocation3 + $0x8] sm:$0x3]  ;;  %v539_v60 = vld [vmem:[#allocation3 + $0xa] sm:$0x3]  ;;  %v607_v25 = vld [vmem:[#allocation3 + $0xc] sm:$0x3] }
 0x6fd   :  { %v379_v29 = vpop.permute.xlu0 %378 }
 0x6fe   :  { %1275 = vmatmul.msk.f32.vlgmr.msrb.gmra.mxu3 %vm143_vm1, %v379_v29  ;;  %1276 = vmatmul.msk.f32.vlgmr.msrb.gmra.mxu0 %vm143_vm1, %v379_v29 }
 0x6ff   :  { %666 = vmatpush.msrb.mxu3 %v1654_v36  ;;  %688 = vmatpush.msrb.mxu0 %v1556_v3 }
 0x701   :  { %667 = vmatpush.msrb.mxu3 %v1659_v37  ;;  %689 = vmatpush.msrb.mxu0 %v1558_v4 }
 0x703   :  { %668 = vmatpush.msrb.mxu3 %v1666_v38  ;;  %690 = vmatpush.msrb.mxu0 %v1572_v7 }
 0x705   :  { %669 = vmatpush.msrb.mxu3 %v1674_v39  ;;  %691 = vmatpush.msrb.mxu0 %v1580_v8 }
 0x77b   :  { %v421_v30 = vpop.f32.mrf.mxu0 }
 0x77c   :  { %v424_v31 = vadd.f32 %v421_v30, %v403_v19 }
 0x77e   :  { %1323 = vtanh.f32 %v424_v31  ;;  %v1287_v31 = vld [vmem:[%s1941_s6 + $0x2] sm:$0x3] }
 0x781   :  { %v399_v32 = vpop.f32.mrf.mxu3 }
 0x782   :  { %v400_v33 = vadd.f32 %v1705_v43, %v399_v32 }
 0x784   :  { %v1324_v3 = vpop.eup %1323  ;;  %402 = vst [vmem:[#allocation3 + $0x14] sm:$0x3] %v400_v33 }
 0x785   :  { %430 = vrot.lane.b32.xlu1 %v1324_v3, %s1949_s1  ;;  %v426_v4 = vmul.f32 0.5, %v1324_v3 }
 0x787   :  { %v427_v34 = vadd.f32 0.5, %v426_v4 }
 0x789   :  { %v428_v7 = vmul.f32 %v427_v34, %v1725_v13 }
 0x7f7   :  { %v431_v35 = vpop.permute.xlu1 %430 }
 0x7f8   :  { %v433_v40 = vmul.f32 %v431_v35, %v427_v34 }
 0x7fa   :  { %435 = vrot.lane.b32.xlu2 %v433_v40, %s1476_s3 }
 0x854   :  { %v436_v8 = vpop.permute.xlu2 %435 }
 0x855   :  { %v438_v41 = vadd.f32 %v436_v8, %v428_v7 }
 0x857   :  { %1325 = vtanh.f32 %v438_v41 }
 0x85d   :  { %v1326_v42 = vpop.eup %1325 }
 0x85e   :  { %441 = vrot.lane.b32.xlu0 %v1326_v42, %s1949_s1 }
 0x8d0   :  { %v442_v44 = vpop.permute.xlu0 %441 }
 0x8d1   :  { %v444_v45 = vmul.f32 %v442_v44, %v427_v34 }
 0x8d3   :  { %446 = vrot.lane.b32.xlu1 %v444_v45, %s1476_s3 }
 0x945   :  { %v447_v46 = vpop.permute.xlu1 %446 }
 0x946   :  { %1277 = vmatmul.msk.f32.vlgmr.msra.gmra.mxu1 %vm143_vm1, %v447_v46  ;;  %1278 = vmatmul.msk.f32.vlgmr.msra.gmra.mxu2 %vm143_vm1, %v447_v46 }
 0x947   :  { %734 = vmatpush.msra.mxu1 %v1654_v36  ;;  %776 = vmatpush.msra.mxu2 %v1801_v16 }
 0x949   :  { %735 = vmatpush.msra.mxu1 %v1659_v37  ;;  %777 = vmatpush.msra.mxu2 %v1803_v17 }
 0x94b   :  { %736 = vmatpush.msra.mxu1 %v1666_v38  ;;  %778 = vmatpush.msra.mxu2 %v1807_v18 }
 0x94d   :  { %737 = vmatpush.msra.mxu1 %v1674_v39  ;;  %779 = vmatpush.msra.mxu2 %v1812_v20 }
 0x9c3   :  { %v467_v47 = vpop.f32.mrf.mxu1 }
 0x9c4   :  { %v468_v48 = vadd.f32 %v1705_v43, %v467_v47 }
 0x9c6   :  { %470 = vst [vmem:[#allocation3 + $0x16] sm:$0x3] %v468_v48 }
 0x9c9   :  { %v489_v50 = vpop.f32.mrf.mxu2 }
 0x9ca   :  { %v492_v51 = vadd.f32 %v489_v50, %v471_v49 }
 0x9cc   :  { %1327 = vtanh.f32 %v492_v51 }
 0x9d2   :  { %v1328_v52 = vpop.eup %1327 }
 0x9d3   :  { %498 = vrot.lane.b32.xlu2 %v1328_v52, %s1949_s1  ;;  %v494_v53 = vmul.f32 0.5, %v1328_v52 }
 0x9d5   :  { %v495_v54 = vadd.f32 0.5, %v494_v53 }
 0x9d7   :  { %v496_v37 = vmul.f32 %v495_v54, %v438_v41 }
 0xa2d   :  { %v499_v36 = vpop.permute.xlu2 %498 }
 0xa2e   :  { %v501_v55 = vmul.f32 %v499_v36, %v495_v54 }
 0xa30   :  { %503 = vrot.lane.b32.xlu0 %v501_v55, %s1476_s3 }
 0xaa2   :  { %v504_v38 = vpop.permute.xlu0 %503 }
 0xaa3   :  { %v506_v39 = vadd.f32 %v504_v38, %v496_v37 }
 0xaa5   :  { %1329 = vtanh.f32 %v506_v39 }
 0xaab   :  { %v1330_v56 = vpop.eup %1329 }
 0xaac   :  { %509 = vrot.lane.b32.xlu1 %v1330_v56, %s1949_s1 }
 0xb1e   :  { %v510_v57 = vpop.permute.xlu1 %509 }
 0xb1f   :  { %v512_v58 = vmul.f32 %v510_v57, %v495_v54 }
 0xb21   :  { %514 = vrot.lane.b32.xlu2 %v512_v58, %s1476_s3 }
 0xb7b   :  { %v515_v59 = vpop.permute.xlu2 %514 }
 0xb7c   :  { %1279 = vmatmul.msk.f32.vlgmr.msra.gmra.mxu3 %vm143_vm1, %v515_v59  ;;  %1280 = vmatmul.msk.f32.vlgmr.msra.gmra.mxu0 %vm143_vm1, %v515_v59 }
 0xb7d   :  { %827 = vmatpush.msra.mxu3 %v1801_v16  ;;  %874 = vmatpush.msra.mxu0 %v1801_v16 }
 0xb7f   :  { %828 = vmatpush.msra.mxu3 %v1803_v17  ;;  %875 = vmatpush.msra.mxu0 %v1803_v17 }
 0xb81   :  { %829 = vmatpush.msra.mxu3 %v1807_v18  ;;  %876 = vmatpush.msra.mxu0 %v1807_v18 }
 0xb83   :  { %830 = vmatpush.msra.mxu3 %v1812_v20  ;;  %877 = vmatpush.msra.mxu0 %v1812_v20 }
 0xbf9   :  { %v557_v61 = vpop.f32.mrf.mxu0 }
 0xbfa   :  { %v560_v62 = vadd.f32 %v557_v61, %v539_v60  ;;  %v675_v61 = vld [vmem:[#allocation3 + $0xe] sm:$0x3] }
 0xbfc   :  { %1331 = vtanh.f32 %v560_v62 }
 0xbff   :  { %v535_v63 = vpop.f32.mrf.mxu3 }
 0xc00   :  { %v536_v0 = vadd.f32 %v1705_v43, %v535_v63 }
 0xc02   :  { %v1332_v1 = vpop.eup %1331  ;;  %538 = vst [vmem:[#allocation3 + $0x18] sm:$0x3] %v536_v0 }
 0xc03   :  { %566 = vrot.lane.b32.xlu0 %v1332_v1, %s1949_s1  ;;  %v562_v2 = vmul.f32 0.5, %v1332_v1 }
 0xc05   :  { %v563_v5 = vadd.f32 0.5, %v562_v2 }
 0xc07   :  { %v564_v10 = vmul.f32 %v563_v5, %v506_v39  ;;  %v809_v39 = vld [vmem:[#allocation3 + $0x12] sm:$0x3] }
 0xc75   :  { %v567_v6 = vpop.permute.xlu0 %566 }
 0xc76   :  { %v569_v9 = vmul.f32 %v567_v6, %v563_v5 }
 0xc78   :  { %571 = vrot.lane.b32.xlu1 %v569_v9, %s1476_s3 }
 0xcea   :  { %v572_v11 = vpop.permute.xlu1 %571 }
 0xceb   :  { %v1796_v12 = vadd.f32 %v572_v11, %v564_v10 }
 0xced   :  { %1333 = vtanh.f32 %v1796_v12 }
 0xcf3   :  { %v1334_v13 = vpop.eup %1333 }
 0xcf4   :  { %577 = vrot.lane.b32.xlu2 %v1334_v13, %s1949_s1 }
 0xd4e   :  { %v578_v14 = vpop.permute.xlu2 %577 }
 0xd4f   :  { %v580_v15 = vmul.f32 %v578_v14, %v563_v5 }
 0xd51   :  { %582 = vrot.lane.b32.xlu0 %v580_v15, %s1476_s3 }
 0xdc3   :  { %v583_v21 = vpop.permute.xlu0 %582 }
 0xdc4   :  { %1281 = vmatmul.msk.f32.vlgmr.msrb.gmra.mxu1 %vm143_vm1, %v583_v21  ;;  %1282 = vmatmul.msk.f32.vlgmr.msrb.gmra.mxu2 %vm143_vm1, %v583_v21 }
 0xdc5   :  { %921 = vmatpush.msrb.mxu1 %v1801_v16  ;;  %968 = vmatpush.msrb.mxu2 %v1801_v16 }
 0xdc7   :  { %922 = vmatpush.msrb.mxu1 %v1803_v17  ;;  %969 = vmatpush.msrb.mxu2 %v1803_v17 }
 0xdc9   :  { %923 = vmatpush.msrb.mxu1 %v1807_v18  ;;  %970 = vmatpush.msrb.mxu2 %v1807_v18 }
 0xdcb   :  { %924 = vmatpush.msrb.mxu1 %v1812_v20  ;;  %971 = vmatpush.msrb.mxu2 %v1812_v20 }
 0xdcc   :  { %1288 = vmatmul.msk.f32.vlgmr.msra.gmra.mxu2 %vm143_vm1, %v1286_v22 }
 0xe41   :  { %v603_v23 = vpop.f32.mrf.mxu1 }
 0xe42   :  { %v604_v24 = vadd.f32 %v1705_v43, %v603_v23  ;;  %v856_v23 = vld [vmem:[#allocation3 + $0x14] sm:$0x3] }
 0xe44   :  { %606 = vst [vmem:[#allocation3 + $0x1a] sm:$0x3] %v604_v24 }
 0xe47   :  { %v625_v26 = vpop.f32.mrf.mxu2 }
 0xe48   :  { %v628_v27 = vadd.f32 %v625_v26, %v607_v25 }
 0xe4a   :  { %1335 = vtanh.f32 %v628_v27 }
 0xe4f   :  { %v781_v29 = vpop.f32.mrf.mxu2 }
 0xe50   :  { %v1336_v19 = vpop.eup %1335  ;;  %v784_v30 = vadd.f32 %v781_v29, %v760_v28 }
 0xe51   :  { %634 = vrot.lane.b32.xlu1 %v1336_v19, %s1949_s1  ;;  %v630_v35 = vmul.f32 0.5, %v1336_v19 }
 0xe52   :  { %1337 = vtanh.f32 %v784_v30 }
 0xe53   :  { %v631_v40 = vadd.f32 0.5, %v630_v35 }
 0xe55   :  { %v632_v47 = vmul.f32 %v631_v40, %v1796_v12 }
 0xe58   :  { %v1338_v32 = vpop.eup %1337 }
 0xe59   :  { %789 = vrot.lane.b32.xlu1 %v1287_v31, %s1476_s3  ;;  %794 = vrot.lane.b32.xlu2 %v1338_v32, %s1949_s1  ;;  %v786_v33 = vmul.f32 0.5, %v1338_v32 }
 0xe5b   :  { %v787_v3 = vadd.f32 0.5, %v786_v33 }
 0xeb3   :  { %v795_v4 = vpop.permute.xlu2 %794 }
 0xeb4   :  { %v797_v34 = vmul.f32 %v795_v4, %v787_v3 }
 0xeb6   :  { %799 = vrot.lane.b32.xlu2 %v797_v34, %s1476_s3 }
 0xec3   :  { %v635_v7 = vpop.permute.xlu1 %634 }
 0xec4   :  { %v637_v8 = vmul.f32 %v635_v7, %v631_v40 }
 0xec6   :  { %639 = vrot.lane.b32.xlu0 %v637_v8, %s1476_s3 }
 0xecb   :  { %v790_v41 = vpop.permute.xlu1 %789 }
 0xecc   :  { %v792_v42 = vmul.f32 %v790_v41, %v787_v3 }
 0xf10   :  { %v800_v44 = vpop.permute.xlu2 %799 }
 0xf11   :  { %v802_v45 = vadd.f32 %v800_v44, %v792_v42 }
 0xf13   :  { %1339 = vtanh.f32 %v802_v45 }
 0xf19   :  { %v1340_v46 = vpop.eup %1339 }
 0xf1a   :  { %805 = vrot.lane.b32.xlu1 %v1340_v46, %s1949_s1 }
 0xf38   :  { %v640_v48 = vpop.permute.xlu0 %639 }
 0xf39   :  { %v1846_v49 = vadd.f32 %v640_v48, %v632_v47  ;;  %v903_v47 = vld [vmem:[#allocation3 + $0x16] sm:$0x3] }
 0xf3b   :  { %1341 = vtanh.f32 %v1846_v49 }
 0xf41   :  { %v1342_v50 = vpop.eup %1341 }
 0xf42   :  { %645 = vrot.lane.b32.xlu0 %v1342_v50, %s1949_s1 }
 0xf8c   :  { %v806_v51 = vpop.permute.xlu1 %805 }
 0xf8d   :  { %v808_v52 = vmul.f32 %v806_v51, %v787_v3 }
 0xf8f   :  { %811 = vrot.lane.b32.xlu0 %v808_v52, %s1476_s3 }
 0xfb4   :  { %v646_v53 = vpop.permute.xlu0 %645 }
 0xfb5   :  { %v648_v54 = vmul.f32 %v646_v53, %v631_v40 }
 0xfb7   :  { %650 = vrot.lane.b32.xlu2 %v648_v54, %s1476_s3 }
0x1001   :  { %v812_v55 = vpop.permute.xlu0 %811 }
0x1011   :  { %v651_v36 = vpop.permute.xlu2 %650 }
0x1012   :  { %1283 = vmatmul.msk.f32.vlgmr.msrb.gmra.mxu3 %vm143_vm1, %v651_v36  ;;  %1284 = vmatmul.msk.f32.vlgmr.msrb.gmra.mxu0 %vm143_vm1, %v651_v36 }
0x1013   :  { %1015 = vmatpush.msrb.mxu3 %v1801_v16  ;;  %1062 = vmatpush.msrb.mxu0 %v1801_v16 }
0x1015   :  { %1016 = vmatpush.msrb.mxu3 %v1803_v17  ;;  %1063 = vmatpush.msrb.mxu0 %v1803_v17 }
0x1017   :  { %1017 = vmatpush.msrb.mxu3 %v1807_v18  ;;  %1064 = vmatpush.msrb.mxu0 %v1807_v18 }
0x1019   :  { %1018 = vmatpush.msrb.mxu3 %v1812_v20  ;;  %1065 = vmatpush.msrb.mxu0 %v1812_v20 }
0x101a   :  { %1289 = vmatmul.msk.f32.vlgmr.msra.gmra.mxu3 %vm143_vm1, %v812_v55 }
0x108f   :  { %v693_v60 = vpop.f32.mrf.mxu0 }
0x1090   :  { %v696_v63 = vadd.f32 %v693_v60, %v675_v61 }
0x1095   :  { %v671_v37 = vpop.f32.mrf.mxu3 }
0x1096   :  { %v672_v38 = vadd.f32 %v1705_v43, %v671_v37  ;;  %v950_v37 = vld [vmem:[#allocation3 + $0x18] sm:$0x3] }
0x1098   :  { %674 = vst [vmem:[#allocation3 + $0x1c] sm:$0x3] %v672_v38 }
0x109d   :  { %v832_v56 = vpop.f32.mrf.mxu3 }
0x109e   :  { %v835_v57 = vadd.f32 %v832_v56, %v809_v39 }
0x10a0   :  { %1343 = vtanh.f32 %v835_v57 }
0x10a1   :  { %1345 = vtanh.f32 %v696_v63 }
0x10a6   :  { %v1344_v58 = vpop.eup %1343 }
0x10a7   :  { %841 = vrot.lane.b32.xlu1 %v1344_v58, %s1949_s1  ;;  %v837_v59 = vmul.f32 0.5, %v1344_v58  ;;  %v1346_v2 = vpop.eup %1345 }
0x10a8   :  { %v698_v13 = vmul.f32 0.5, %v1346_v2 }
0x10a9   :  { %v838_v62 = vadd.f32 0.5, %v837_v59 }
0x10aa   :  { %v699_v15 = vadd.f32 0.5, %v698_v13 }
0x10ab   :  { %v839_v5 = vmul.f32 %v838_v62, %v802_v45 }
0x10ac   :  { %v700_v27 = vmul.f32 %v699_v15, %v1846_v49 }
0x1119   :  { %v842_v0 = vpop.permute.xlu1 %841 }
0x111a   :  { %v844_v1 = vmul.f32 %v842_v0, %v838_v62 }
0x111c   :  { %846 = vrot.lane.b32.xlu2 %v844_v1, %s1476_s3 }
0x1124   :  { %702 = vrot.lane.b32.xlu2 %v1346_v2, %s1949_s1 }
0x1176   :  { %v847_v6 = vpop.permute.xlu2 %846 }
0x1177   :  { %v849_v9 = vadd.f32 %v847_v6, %v839_v5  ;;  %v997_v6 = vld [vmem:[#allocation3 + $0x1a] sm:$0x3] }
0x1179   :  { %1347 = vtanh.f32 %v849_v9 }
0x117e   :  { %v703_v14 = vpop.permute.xlu2 %702 }
0x117f   :  { %v1348_v10 = vpop.eup %1347  ;;  %v705_v21 = vmul.f32 %v703_v14, %v699_v15 }
0x1180   :  { %852 = vrot.lane.b32.xlu0 %v1348_v10, %s1949_s1 }
0x11f2   :  { %v853_v11 = vpop.permute.xlu0 %852 }
0x11f3   :  { %v855_v12 = vmul.f32 %v853_v11, %v838_v62 }
0x11f5   :  { %858 = vrot.lane.b32.xlu1 %v855_v12, %s1476_s3 }
0x11fd   :  { %707 = vrot.lane.b32.xlu1 %v705_v21, %s1476_s3 }
0x1267   :  { %v859_v22 = vpop.permute.xlu1 %858 }
0x1268   :  { %1290 = vmatmul.msk.f32.vlgmr.msra.gmra.mxu0 %vm143_vm1, %v859_v22 }
0x126f   :  { %v708_v26 = vpop.permute.xlu1 %707 }
0x1270   :  { %v1872_v28 = vadd.f32 %v708_v26, %v700_v27 }
0x12e5   :  { %v879_v24 = vpop.f32.mrf.mxu0 }
0x12e6   :  { %v882_v25 = vadd.f32 %v879_v24, %v856_v23 }
0x12e8   :  { %1349 = vtanh.f32 %v882_v25 }
0x12e9   :  { %1351 = vtanh.f32 %v1872_v28 }
0x12ee   :  { %v1350_v29 = vpop.eup %1349 }
0x12ef   :  { %888 = vrot.lane.b32.xlu0 %v1350_v29, %s1949_s1  ;;  %v1352_v19 = vpop.eup %1351  ;;  %v884_v30 = vmul.f32 0.5, %v1350_v29  ;;  %v1044_v29 = vld [vmem:[#allocation3 + $0x1c] sm:$0x3] }
0x12f1   :  { %v885_v31 = vadd.f32 0.5, %v884_v30 }
0x12f3   :  { %v886_v34 = vmul.f32 %v885_v31, %v849_v9 }
0x12f7   :  { %713 = vrot.lane.b32.xlu0 %v1352_v19, %s1949_s1 }
0x1361   :  { %v889_v32 = vpop.permute.xlu0 %888 }
0x1362   :  { %v891_v33 = vmul.f32 %v889_v32, %v885_v31 }
0x1364   :  { %893 = vrot.lane.b32.xlu2 %v891_v33, %s1476_s3 }
0x1369   :  { %v714_v3 = vpop.permute.xlu0 %713 }
0x136a   :  { %v716_v4 = vmul.f32 %v714_v3, %v699_v15 }
0x136c   :  { %718 = vrot.lane.b32.xlu2 %v716_v4, %s1476_s3 }
0x13be   :  { %v894_v35 = vpop.permute.xlu2 %893 }
0x13bf   :  { %v896_v40 = vadd.f32 %v894_v35, %v886_v34 }
0x13c1   :  { %1353 = vtanh.f32 %v896_v40 }
0x13c6   :  { %v719_v7 = vpop.permute.xlu2 %718 }
0x13c7   :  { %v1354_v8 = vpop.eup %1353  ;;  %745 = vst.msk [vmem:[#allocation10] sm:$0x3] %vm744_vm2, %v719_v7  ;;  %1285 = vmatmul.msk.f32.vlgmr.msra.gmra.mxu1 %vm143_vm1, %v719_v7 }
0x13c8   :  { %899 = vrot.lane.b32.xlu1 %v1354_v8, %s1949_s1  ;;  %1109 = vmatpush.msra.mxu1 %v1801_v16 }
0x13ca   :  { %1110 = vmatpush.msra.mxu1 %v1803_v17 }
0x13cc   :  { %1111 = vmatpush.msra.mxu1 %v1807_v18 }
0x13ce   :  { %1112 = vmatpush.msra.mxu1 %v1812_v20 }
0x143a   :  { %v900_v41 = vpop.permute.xlu1 %899 }
0x143b   :  { %v902_v42 = vmul.f32 %v900_v41, %v885_v31 }
0x143d   :  { %905 = vrot.lane.b32.xlu0 %v902_v42, %s1476_s3 }
0x1444   :  { %v739_v44 = vpop.f32.mrf.mxu1 }
0x1445   :  { %v740_v45 = vadd.f32 %v1705_v43, %v739_v44 }
0x1447   :  { %742 = vst [vmem:[#allocation3 + $0x1e] sm:$0x3] %v740_v45 }
0x144e   :  { %v1091_v44 = vld [vmem:[#allocation3 + $0x1e] sm:$0x3] }
0x14af   :  { %v906_v46 = vpop.permute.xlu0 %905 }
0x14b0   :  { %1291 = vmatmul.msk.f32.vlgmr.msrb.gmra.mxu1 %vm143_vm1, %v906_v46 }
0x152d   :  { %v926_v48 = vpop.f32.mrf.mxu1 }
0x152e   :  { %v929_v16 = vadd.f32 %v926_v48, %v903_v47  ;;  %v1309_v48 = vld [vmem:[%s1942_s7] ss:$0 sm:$0xff]  ;;  %s1478_s7 = smov [#allocation10]  }
0x152f   :  { %s1196_s14 = sshll.u32 %s1478_s7, 4  ;;  %s1197_s14 = int_to_ptr.vmem [resolvable:$true] %s1196_s14 }
0x1530   :  { %1355 = vtanh.f32 %v929_v16 }
0x1536   :  { %v1356_v17 = vpop.eup %1355 }
0x1537   :  { %935 = vrot.lane.b32.xlu1 %v1356_v17, %s1949_s1  ;;  %v931_v18 = vmul.f32 0.5, %v1356_v17 }
0x1539   :  { %v932_v20 = vadd.f32 0.5, %v931_v18 }
0x153b   :  { %v933_v51 = vmul.f32 %v932_v20, %v896_v40 }
0x15a9   :  { %v936_v49 = vpop.permute.xlu1 %935 }
0x15aa   :  { %v938_v50 = vmul.f32 %v936_v49, %v932_v20 }
0x15ac   :  { %940 = vrot.lane.b32.xlu2 %v938_v50, %s1476_s3 }
0x1606   :  { %v941_v52 = vpop.permute.xlu2 %940 }
0x1607   :  { %v943_v43 = vadd.f32 %v941_v52, %v933_v51 }
0x1609   :  { %1357 = vtanh.f32 %v943_v43 }
0x160f   :  { %v1358_v53 = vpop.eup %1357 }
0x1610   :  { %946 = vrot.lane.b32.xlu0 %v1358_v53, %s1949_s1 }
0x1682   :  { %v947_v54 = vpop.permute.xlu0 %946 }
0x1683   :  { %v949_v36 = vmul.f32 %v947_v54, %v932_v20 }
0x1685   :  { %952 = vrot.lane.b32.xlu1 %v949_v36, %s1476_s3 }
0x16f7   :  { %v953_v55 = vpop.permute.xlu1 %952 }
0x16f8   :  { %1292 = vmatmul.msk.f32.vlgmr.msrb.gmra.mxu2 %vm143_vm1, %v953_v55 }
0x177b   :  { %v973_v38 = vpop.f32.mrf.mxu2 }
0x177c   :  { %v976_v39 = vadd.f32 %v973_v38, %v950_v37 }
0x177e   :  { %1359 = vtanh.f32 %v976_v39 }
0x1784   :  { %v1360_v56 = vpop.eup %1359 }
0x1785   :  { %982 = vrot.lane.b32.xlu2 %v1360_v56, %s1949_s1  ;;  %v978_v57 = vmul.f32 0.5, %v1360_v56  ;;  %v1310_v56 = vld [vmem:[#allocation4] ss:$0 sm:$0xff] }
0x1787   :  { %v979_v58 = vadd.f32 0.5, %v978_v57 }
0x1789   :  { %v980_v61 = vmul.f32 %v979_v58, %v943_v43 }
0x17df   :  { %v983_v59 = vpop.permute.xlu2 %982 }
0x17e0   :  { %v985_v60 = vmul.f32 %v983_v59, %v979_v58 }
0x17e2   :  { %987 = vrot.lane.b32.xlu0 %v985_v60, %s1476_s3 }
0x1854   :  { %v988_v62 = vpop.permute.xlu0 %987 }
0x1855   :  { %v990_v63 = vadd.f32 %v988_v62, %v980_v61 }
0x1857   :  { %1361 = vtanh.f32 %v990_v63 }
0x185d   :  { %v1362_v0 = vpop.eup %1361 }
0x185e   :  { %993 = vrot.lane.b32.xlu1 %v1362_v0, %s1949_s1 }
0x18d0   :  { %v994_v1 = vpop.permute.xlu1 %993 }
0x18d1   :  { %v996_v2 = vmul.f32 %v994_v1, %v979_v58 }
0x18d3   :  { %999 = vrot.lane.b32.xlu2 %v996_v2, %s1476_s3 }
0x192d   :  { %v1000_v5 = vpop.permute.xlu2 %999 }
0x192e   :  { %1293 = vmatmul.msk.f32.vlgmr.msrb.gmra.mxu3 %vm143_vm1, %v1000_v5 }
0x19b1   :  { %v1020_v9 = vpop.f32.mrf.mxu3 }
0x19b2   :  { %v1023_v10 = vadd.f32 %v1020_v9, %v997_v6 }
0x19b4   :  { %1363 = vtanh.f32 %v1023_v10 }
0x19ba   :  { %v1364_v11 = vpop.eup %1363 }
0x19bb   :  { %1029 = vrot.lane.b32.xlu0 %v1364_v11, %s1949_s1  ;;  %v1025_v12 = vmul.f32 0.5, %v1364_v11 }
0x19bd   :  { %v1026_v13 = vadd.f32 0.5, %v1025_v12 }
0x19bf   :  { %v1027_v21 = vmul.f32 %v1026_v13, %v990_v63 }
0x1a2d   :  { %v1030_v14 = vpop.permute.xlu0 %1029 }
0x1a2e   :  { %v1032_v15 = vmul.f32 %v1030_v14, %v1026_v13 }
0x1a30   :  { %1034 = vrot.lane.b32.xlu1 %v1032_v15, %s1476_s3 }
0x1aa2   :  { %v1035_v22 = vpop.permute.xlu1 %1034 }
0x1aa3   :  { %v1037_v23 = vadd.f32 %v1035_v22, %v1027_v21 }
0x1aa5   :  { %1365 = vtanh.f32 %v1037_v23 }
0x1aab   :  { %v1366_v24 = vpop.eup %1365 }
0x1aac   :  { %1040 = vrot.lane.b32.xlu2 %v1366_v24, %s1949_s1 }
0x1b06   :  { %v1041_v25 = vpop.permute.xlu2 %1040 }
0x1b07   :  { %v1043_v26 = vmul.f32 %v1041_v25, %v1026_v13 }
0x1b09   :  { %1046 = vrot.lane.b32.xlu0 %v1043_v26, %s1476_s3 }
0x1b7b   :  { %v1047_v27 = vpop.permute.xlu0 %1046 }
0x1b7c   :  { %1294 = vmatmul.msk.f32.vlgmr.msrb.gmra.mxu0 %vm143_vm1, %v1047_v27 }
0x1bf9   :  { %v1067_v19 = vpop.f32.mrf.mxu0 }
0x1bfa   :  { %v1070_v30 = vadd.f32 %v1067_v19, %v1044_v29 }
0x1bfc   :  { %1367 = vtanh.f32 %v1070_v30 }
0x1c02   :  { %v1368_v31 = vpop.eup %1367 }
0x1c03   :  { %1076 = vrot.lane.b32.xlu1 %v1368_v31, %s1949_s1  ;;  %v1072_v32 = vmul.f32 0.5, %v1368_v31 }
0x1c05   :  { %v1073_v33 = vadd.f32 0.5, %v1072_v32 }
0x1c07   :  { %v1074_v34 = vmul.f32 %v1073_v33, %v1037_v23 }
0x1c75   :  { %v1077_v3 = vpop.permute.xlu1 %1076 }
0x1c76   :  { %v1079_v4 = vmul.f32 %v1077_v3, %v1073_v33 }
0x1c78   :  { %1081 = vrot.lane.b32.xlu2 %v1079_v4, %s1476_s3 }
0x1cd2   :  { %v1082_v35 = vpop.permute.xlu2 %1081 }
0x1cd3   :  { %v1084_v40 = vadd.f32 %v1082_v35, %v1074_v34 }
0x1cd5   :  { %1369 = vtanh.f32 %v1084_v40 }
0x1cdb   :  { %v1370_v7 = vpop.eup %1369 }
0x1cdc   :  { %1087 = vrot.lane.b32.xlu0 %v1370_v7, %s1949_s1 }
0x1d4e   :  { %v1088_v8 = vpop.permute.xlu0 %1087 }
0x1d4f   :  { %v1090_v41 = vmul.f32 %v1088_v8, %v1073_v33 }
0x1d51   :  { %1093 = vrot.lane.b32.xlu1 %v1090_v41, %s1476_s3 }
0x1dc3   :  { %v1094_v42 = vpop.permute.xlu1 %1093 }
0x1dc4   :  { %1295 = vmatmul.msk.f32.vlgmr.msra.gmra.mxu1 %vm143_vm1, %v1094_v42 }
0x1e41   :  { %v1114_v45 = vpop.f32.mrf.mxu1 }
0x1e42   :  { %v1117_v46 = vadd.f32 %v1114_v45, %v1091_v44 }
0x1e44   :  { %1371 = vtanh.f32 %v1117_v46 }
0x1e4a   :  { %v1372_v47 = vpop.eup %1371 }
0x1e4b   :  { %1123 = vrot.lane.b32.xlu2 %v1372_v47, %s1949_s1  ;;  %v1119_v16 = vmul.f32 0.5, %v1372_v47 }
0x1e4d   :  { %v1120_v17 = vadd.f32 0.5, %v1119_v16 }
0x1e4f   :  { %v1121_v51 = vmul.f32 %v1120_v17, %v1084_v40 }
0x1e53   :  { %1153 = vrot.lane.b32.xlu2 %v1309_v48, %s1477_s29 }
0x1e5b   :  { %747 = vrot.lane.b32.xlu2 %v1872_v28, %s1477_s29 }
0x1ea5   :  { %v1124_v18 = vpop.permute.xlu2 %1123 }
0x1ea6   :  { %v1126_v20 = vmul.f32 %v1124_v18, %v1120_v17 }
0x1ea8   :  { %1128 = vrot.lane.b32.xlu0 %v1126_v20, %s1476_s3 }
0x1ead   :  { %v1154_v49 = vpop.permute.xlu2 %1153 }
0x1eb5   :  { %v748_v50 = vpop.permute.xlu2 %747 }
0x1eb6   :  { %750 = vst.msk [vmem:[#allocation11] sm:$0x3] %vm744_vm2, %v748_v50 }
0x1f1a   :  { %v1129_v52 = vpop.permute.xlu0 %1128 }
0x1f1b   :  { %v1131_v43 = vadd.f32 %v1129_v52, %v1121_v51 }
0x1f1d   :  { %1373 = vtanh.f32 %v1131_v43  ;;  %1145 = vrot.lane.b32.xlu2 %v1131_v43, %s1477_s29 }
0x1f23   :  { %v1374_v53 = vpop.eup %1373 }
0x1f24   :  { %1134 = vrot.lane.b32.xlu1 %v1374_v53, %s1949_s1 }
0x1f77   :  { %v1146_v54 = vpop.permute.xlu2 %1145 }
0x1f78   :  { %1149 = vst.msk [vmem:[#allocation11 + $0x2] sm:$0x3] %vm744_vm2, %v1146_v54 }
0x1f79   :  { %1217 = dma.vmem_to_hbm [thread:$0]  %s1210_s18, 64, %s1212_s4, [#allocation12], %s1476_s3, %s1476_s3, %s1480_s22  }
0x1f96   :  { %v1135_v28 = vpop.permute.xlu1 %1134 }
0x1f97   :  { %v1137_v36 = vmul.f32 %v1135_v28, %v1120_v17 }
0x1f99   :  { %v1156_v55 = vmul.f32 %v1154_v49, %v1137_v36 }
0x1f9b   :  { %1158 = vrot.lane.b32.xlu0 %v1156_v55, %s1476_s3 }
0x1fa3   :  { %1139 = vrot.lane.b32.xlu0 %v1137_v36, %s1476_s3 }
0x200d   :  { %v1159_v37 = vpop.permute.xlu0 %1158 }
0x200e   :  { %v1161_v38 = vsel %vm744_vm2, %v1159_v37, 0.0 }
0x200f   :  { %1162 = vadd.xlane.f32.xlu1 %v1161_v38 }
0x2015   :  { %v1140_v39 = vpop.permute.xlu0 %1139 }
0x2016   :  { %1143 = vst.msk [vmem:[#allocation10 + $0x2] sm:$0x3] %vm744_vm2, %v1140_v39 }
0x2017   :  { %1204 = dma.vmem_to_hbm [thread:$0]  %s1197_s14, 64, %s1199_s16, [#allocation7], %s1476_s3, %s1476_s3, %s1480_s22  }
0x2082   :  { %v1163_v57 = vpop.xlane.xlu1 %1162 }
0x2083   :  { %v1168_v58 = vadd.f32 %v1310_v56, %v1163_v57 }
0x2085   :  { %v1296_v59 = vmul.f32 -1.442695, %v1168_v58 }
0x2087   :  { %1375 = vpow2.f32 %v1296_v59 }
0x208d   :  { %v1376_v60 = vpop.eup %1375 }
0x208e   :  { %v1172_v61 = vadd.f32 1.0, %v1376_v60 }
0x2090   :  { %1377 = vrcp.f32 %v1172_v61  ;;  %v1184_v1 = vand.u32 2147483648, %v1172_v61  ;;  %v1182_v5 = vand.u32 2147483647, %v1172_v61  ;;  %vm1178_vm4 = vweird.f32 %v1172_v61 }
0x2092   :  { %v1185_v9 = vor.u32 1.1754944e-38, %v1184_v1  ;;  %vm1183_vm7 = vcmp.eq.f32.partialorder %v1182_v5, 8.507059e+37 }
0x2096   :  { %v1378_v62 = vpop.eup %1377 }
0x2097   :  { %v1174_v63 = vmul.f32 %v1378_v62, %v1172_v61  ;;  %vm1179_vm3 = vweird.f32 %v1378_v62 }
0x2098   :  { %vm1180_vm6 = vmor %vm1178_vm4, %vm1179_vm3 }
0x2099   :  { %v1175_v0 = vsub.f32 1.0, %v1174_v63 }
0x209b   :  { %v1176_v2 = vmul.f32 %v1378_v62, %v1175_v0 }
0x209d   :  { %v1177_v6 = vadd.f32 %v1378_v62, %v1176_v2 }
0x209f   :  { %v1181_v10 = vsel %vm1180_vm6, %v1378_v62, %v1177_v6 }
0x20a0   :  { %v1186_v11 = vsel %vm1183_vm7, %v1185_v9, %v1181_v10 }
0x20a1   :  { %1189 = vst.msk [vmem:[%s1944_s9] sm:$0x3] %vm1188_vm5, %v1186_v11 }
0x20a2   :  { %1467 = dma.done.wait [#allocation7], 64  }
0x20a3   :  { %1468 = vsyncadd [#allocation7], 4294967232 }
0x20a4   :  { %1469 = dma.done.wait [#allocation12], 64  }
0x20a5   :  { %1470 = vsyncadd [#allocation12], 4294967232 }
0x20a6   :  { %1228 = vsyncpa [#allocation6], 1 }
0x20a7   :  { %1229 = vsyncpa [#allocation7], 1 }
0x20a8   :  { %1230 = vsyncpa [#allocation12], 1 }
0x20a9   :  { %1231 = vsyncpa [#allocation8], 1 }

</bundles_post_ra>
